<compile_context>
chip_gen: v7x
topology: tpu7x:2x2x1
jax: 0.10.0
libtpu: 0.0.40
codegen_flags: <defaults>
</compile_context>

<pallas_src>
import functools

import jax
import jax.numpy as jnp
import numpy as np
from jax.experimental import pallas as pl
from jax.experimental.pallas import tpu as pltpu

# Deterministic stand-ins for the optuna trial suggestions.
NUM_LAYERS = 2            # trail.suggest_int('generator_layers', 1, 4)
HIDDEN_SIZE = 32          # trail.suggest_int('generator_hidden_size', 32, 128, 16)
NOISE_SIZE = 100          # module default
OUTPUT_SIZE = 128         # module default


def _round_up(x, m):
    return (x + m - 1) // m * m


def _generator_kernel(num_layers, noise_ref, h0_ref, w_ref, b_ref, out_ref, hT_ref):
    """noise_ref: (T*B, Ip) bf16 (time-major, row = t*B+b)
       h0_ref:    (L, B, H)  f32
       w_ref:     (rows, 3*Hp) bf16  -- [w_ih_0; w_hh_0; w_ih_1; w_hh_1; ...; w_out]
       b_ref:     (2L+1, 3*Hp) f32   -- rows 0..L-1: bx_l, rows L..2L-1: b_hn_l, row 2L: b_out
       out_ref:   (T, B, O)  f32  (time-major log-probs; host transposes to (B,T,O))
       hT_ref:    (L, B, H)  f32
    """
    L = num_layers
    _, B, H = h0_ref.shape
    T, _, O = out_ref.shape
    Ip = noise_ref.shape[1]
    G3 = b_ref.shape[1]            # 3 * Hp
    Hp = G3 // 3                   # per-gate 128-lane block width

    # ---- unpack weight / bias blobs with static, aligned slices ----------------
    w_ih, w_hh = [], []
    row = 0
    for l in range(L):
        in_rows = Ip if l == 0 else H
        w_ih.append(w_ref[row:row + in_rows, :]); row += in_rows       # (in, 3Hp) bf16
        w_hh.append(w_ref[row:row + H, :]);       row += H             # (H, 3Hp)  bf16
    w_out = w_ref[row:row + H, :O]                                     # (H, O)    bf16

    bx = [b_ref[l:l + 1, :] for l in range(L)]                         # (1, 3Hp) f32
    # Broadcasts hoisted out of the recurrence (JAX does not CSE broadcast_in_dim).
    bx_b = [None] * L
    for l in range(1, L):
        bx_b[l] = jnp.broadcast_to(bx[l], (B, G3))                     # (B, 3Hp)
    bhn_b = [jnp.broadcast_to(b_ref[L + l:L + l + 1, :H], (B, H)) for l in range(L)]
    b_out = b_ref[2 * L:2 * L + 1, :O]                                 # (1, O)

    # ---- layer-0 input projection for ALL timesteps in one MXU op --------------
    # biases [b_ir+b_hr, b_iz+b_hz, b_in] are already folded into bx[0].
    xp0 = (jnp.dot(noise_ref[...], w_ih[0], preferred_element_type=jnp.float32)
           + bx[0])                                                    # (T*B, 3Hp) f32

    # ---- GRU cell (PyTorch gate order r, z, n; gates padded to 128-lane blocks) --
    def gru_cell(pre, h_prev, w_hh_l, bhn_l):
        g = jnp.dot(h_prev.astype(jnp.bfloat16), w_hh_l,
                    preferred_element_type=jnp.float32)                # (B, 3Hp)
        r = jax.nn.sigmoid(pre[:, 0:H] + g[:, 0:H])
        z = jax.nn.sigmoid(pre[:, Hp:Hp + H] + g[:, Hp:Hp + H])
        n = jnp.tanh(pre[:, 2 * Hp:2 * Hp + H]
                     + r * (g[:, 2 * Hp:2 * Hp + H] + bhn_l))
        return n + z * (h_prev - n)          # == (1 - z) * n + z * h_prev

    # ---- wavefront-pipelined recurrence: step s runs (layer l, time t=s-l) ------
    h = [h0_ref[l] for l in range(L)]        # h[l] = most recent hidden of layer l
    y_rows = []                              # last-layer outputs, time order
    for s in range(T + L - 1):
        new_h = {}
        for l in range(L):
            t = s - l
            if 0 <= t < T:
                if l == 0:
                    pre = xp0[t * B:(t + 1) * B, :]                    # aligned slab
                else:
                    # h[l-1] still holds h_{l-1, t} (committed last wavefront step)
                    pre = (jnp.dot(h[l - 1].astype(jnp.bfloat16), w_ih[l],
                                   preferred_element_type=jnp.float32)
                           + bx_b[l])
                new_h[l] = gru_cell(pre, h[l], w_hh[l], bhn_b[l])
        for l, v in new_h.items():           # commit after all cells of this step
            h[l] = v
            if l == L - 1:
                y_rows.append(v)

    for l in range(L):
        hT_ref[l] = h[l]

    # ---- Linear(H -> O) on the time-major output slab, lane-dense O -------------
    y = jnp.concatenate(y_rows, axis=0)                                # (T*B, H)
    logits = (jnp.dot(y.astype(jnp.bfloat16), w_out,
                      preferred_element_type=jnp.float32) + b_out)     # (T*B, O)
    logits = logits.reshape(T, B, O)

    # ---- LogSoftmax over dim=1 of (B,T,O) == the time axis (axis 0 here) --------
    m = jnp.max(logits, axis=0, keepdims=True)
    shifted = logits - m
    lse = jnp.log(jnp.sum(jnp.exp(shifted), axis=0, keepdims=True))
    out_ref[...] = shifted - lse


def _prep_inputs(noise, h0, params):
    """Pack PyTorch-style per-gate params into the fused kernel layout.

    Returns time-major bf16 noise (T*B, Ip), bf16 weight blob (rows, 3Hp) and
    f32 bias blob (2L+1, 3Hp).  Each gate is zero-padded to its own 128-lane
    block so every in-kernel gate slice starts on a vreg boundary.
    """
    B, T, I = noise.shape
    L, _, H = h0.shape
    O = params["w_out"].shape[1]
    assert H % 8 == 0, "hidden_size must be a multiple of 8 (module uses step 16)"
    Hp = _round_up(H, 128)
    G3 = 3 * Hp
    Ip = _round_up(I, 16)            # keep bf16 sublane-packed row offsets aligned
    assert O <= G3, "output_size must fit in the 3*Hp column blob"

    # time-major noise, feature dim zero-padded to Ip, bf16 (MXU operand dtype)
    noise_tm = jnp.transpose(noise, (1, 0, 2)).reshape(T * B, I)
    noise_tm = jnp.pad(noise_tm, ((0, 0), (0, Ip - I))).astype(jnp.bfloat16)

    def pad_gates(w):                # (3, in, H) -> (in, 3*Hp), gate-major, zero-padded
        return jnp.concatenate(
            [jnp.pad(w[g], ((0, 0), (0, Hp - H))) for g in range(3)], axis=1)

    w_rows, bx_rows, bhn_rows = [], [], []
    for l, (w_ih, w_hh, b_ih, b_hh) in enumerate(params["layers"]):
        in_dim = w_ih.shape[1]
        w_ih_cat = pad_gates(w_ih)                                     # (in_dim, 3Hp)
        if l == 0:
            w_ih_cat = jnp.pad(w_ih_cat, ((0, Ip - in_dim), (0, 0)))   # (Ip, 3Hp)
        else:
            assert in_dim == H
        w_rows.append(w_ih_cat)
        w_rows.append(pad_gates(w_hh))                                 # (H, 3Hp)
        bx_rows.append(jnp.concatenate(
            [jnp.pad(b_ih[0] + b_hh[0], ((0, 0), (0, Hp - H))),
             jnp.pad(b_ih[1] + b_hh[1], ((0, 0), (0, Hp - H))),
             jnp.pad(b_ih[2],           ((0, 0), (0, Hp - H)))], axis=1))   # (1, 3Hp)
        bhn_rows.append(jnp.pad(b_hh[2], ((0, 0), (0, G3 - H))))            # (1, 3Hp)

    w_rows.append(jnp.pad(params["w_out"], ((0, 0), (0, G3 - O))))     # (H, 3Hp)
    b_out_row = jnp.pad(params["b_out"], ((0, 0), (0, G3 - O)))        # (1, 3Hp)

    w_blob = jnp.concatenate(w_rows, axis=0).astype(jnp.bfloat16)      # (Ip+(2L-1)*H+H, 3Hp)
    b_blob = jnp.concatenate(bx_rows + bhn_rows + [b_out_row], axis=0) # (2L+1, 3Hp) f32
    return noise_tm, w_blob, b_blob


@jax.jit
def generator_forward(noise, h0, params):
    """noise: (B, T, I) f32, h0: (L, B, H) f32 -> (log_probs (B,T,O), hT (L,B,H))."""
    B, T, I = noise.shape
    L, _, H = h0.shape
    O = params["w_out"].shape[1]

    noise_tm, w_blob, b_blob = _prep_inputs(noise, h0, params)

    vmem = pl.BlockSpec(memory_space=pltpu.MemorySpace.VMEM)
    kernel = functools.partial(_generator_kernel, L)

    # Single grid point: everything is VMEM-resident; 4 input DMAs total.
    out_tm, hT = pl.pallas_call(
        kernel,
        out_shape=(
            jax.ShapeDtypeStruct((T, B, O), jnp.float32),   # time-major in-kernel
            jax.ShapeDtypeStruct((L, B, H), jnp.float32),
        ),
        in_specs=[vmem, vmem, vmem, vmem],
        out_specs=(vmem, vmem),
    )(noise_tm, h0, w_blob, b_blob)

    return jnp.transpose(out_tm, (1, 0, 2)), hT             # -> (B, T, O)


def init_params(key, num_layers, noise_size, hidden, output_size):
    """Deterministic init mimicking PyTorch's U(-1/sqrt(H), 1/sqrt(H))."""
    bound = 1.0 / np.sqrt(hidden)
    layers = []
    for l in range(num_layers):
        in_dim = noise_size if l == 0 else hidden
        key, k1, k2, k3, k4 = jax.random.split(key, 5)
        w_ih = jax.random.uniform(k1, (3, in_dim, hidden), jnp.float32, -bound, bound)
        w_hh = jax.random.uniform(k2, (3, hidden, hidden), jnp.float32, -bound, bound)
        b_ih = jax.random.uniform(k3, (3, 1, hidden), jnp.float32, -bound, bound)
        b_hh = jax.random.uniform(k4, (3, 1, hidden), jnp.float32, -bound, bound)
        layers.append((w_ih, w_hh, b_ih, b_hh))
    key, k5, k6 = jax.random.split(key, 3)
    w_out = jax.random.uniform(k5, (hidden, output_size), jnp.float32, -bound, bound)
    b_out = jax.random.uniform(k6, (1, output_size), jnp.float32, -bound, bound)
    return {"layers": layers, "w_out": w_out, "b_out": b_out}


def reference_forward(noise, h0, params, matmul_dtype=jnp.float32):
    """Pure-JAX reference of the PyTorch semantics.

    matmul_dtype=float32  -> exact PyTorch-style f32 math (loose-tolerance check).
    matmul_dtype=bfloat16 -> mimics the kernel's MXU numerics (tight-tolerance
                             check that catches gate-order / lane-slicing bugs).
    """
    def mm(a, b):
        return jnp.dot(a.astype(matmul_dtype), b.astype(matmul_dtype),
                       preferred_element_type=jnp.float32)

    x = noise
    finals = []
    for l, (w_ih, w_hh, b_ih, b_hh) in enumerate(params["layers"]):
        h = h0[l]
        ys = []
        for t in range(x.shape[1]):
            xt = x[:, t, :]
            r = jax.nn.sigmoid(mm(xt, w_ih[0]) + b_ih[0] + mm(h, w_hh[0]) + b_hh[0])
            z = jax.nn.sigmoid(mm(xt, w_ih[1]) + b_ih[1] + mm(h, w_hh[1]) + b_hh[1])
            n = jnp.tanh(mm(xt, w_ih[2]) + b_ih[2] + r * (mm(h, w_hh[2]) + b_hh[2]))
            h = (1.0 - z) * n + z * h
            ys.append(h)
        x = jnp.stack(ys, axis=1)
        finals.append(h)
    B, T, _ = x.shape
    logits = mm(x.reshape(B * T, -1), params["w_out"]).reshape(B, T, -1) + params["b_out"]
    return jax.nn.log_softmax(logits, axis=1), jnp.stack(finals, axis=0)


if __name__ == "__main__":
    # B=8 fills the 8 sublanes of a vreg (top item of the perf review); T=8 seq.
    B, T = 8, 8
    key = jax.random.PRNGKey(0)
    k_params, k_noise = jax.random.split(key)

    params = init_params(k_params, NUM_LAYERS, NOISE_SIZE, HIDDEN_SIZE, OUTPUT_SIZE)
    noise = jax.random.normal(k_noise, (B, T, NOISE_SIZE), jnp.float32)
    hidden = jnp.zeros((NUM_LAYERS, B, HIDDEN_SIZE), jnp.float32)      # initHidden

    out, hT = generator_forward(noise, hidden, params)
    jax.block_until_ready((out, hT))

    # (1) matched-numerics reference (bf16 matmul operands, f32 accumulation):
    #     tight tolerance catches gate-order / lane-slicing / wavefront bugs.
    mref_out, mref_hT = reference_forward(noise, hidden, params, matmul_dtype=jnp.bfloat16)
    np.testing.assert_allclose(np.asarray(out), np.asarray(mref_out), rtol=1e-2, atol=1e-2)
    np.testing.assert_allclose(np.asarray(hT), np.asarray(mref_hT), rtol=1e-2, atol=1e-2)

    # (2) full-f32 reference (PyTorch semantics): loose tolerance covers bf16 MXU rounding.
    fref_out, fref_hT = reference_forward(noise, hidden, params, matmul_dtype=jnp.float32)
    np.testing.assert_allclose(np.asarray(out), np.asarray(fref_out), rtol=1e-1, atol=1e-1)
    np.testing.assert_allclose(np.asarray(hT), np.asarray(fref_hT), rtol=1e-1, atol=5e-2)

    print("KERNEL_OK")
</pallas_src>

<mosaic_0001>
module attributes {stable_mosaic.version = 11 : i64} {
  func.func @_generator_kernel(%arg0: memref<64x112xbf16, #tpu.memory_space<vmem>>, %arg1: memref<2x8x32xf32, #tpu.memory_space<vmem>>, %arg2: memref<240x384xbf16, #tpu.memory_space<vmem>>, %arg3: memref<5x384xf32, #tpu.memory_space<vmem>>, %arg4: memref<8x8x128xf32, #tpu.memory_space<vmem>>, %arg5: memref<2x8x32xf32, #tpu.memory_space<vmem>>) attributes {dimension_semantics = [], scalar_prefetch = 0 : i64, scratch_operands = 0 : i64, tpu.core_type = #tpu.core_type<tc>} {
    %c0 = arith.constant 0 : index
    %c0_0 = arith.constant 0 : index
    %0 = vector.load %arg2[%c0, %c0_0] : memref<240x384xbf16, #tpu.memory_space<vmem>>, vector<112x384xbf16>
    %c112 = arith.constant 112 : index
    %c0_1 = arith.constant 0 : index
    %1 = vector.load %arg2[%c112, %c0_1] : memref<240x384xbf16, #tpu.memory_space<vmem>>, vector<32x384xbf16>
    %c144 = arith.constant 144 : index
    %c0_2 = arith.constant 0 : index
    %2 = vector.load %arg2[%c144, %c0_2] : memref<240x384xbf16, #tpu.memory_space<vmem>>, vector<32x384xbf16>
    %c176 = arith.constant 176 : index
    %c0_3 = arith.constant 0 : index
    %3 = vector.load %arg2[%c176, %c0_3] : memref<240x384xbf16, #tpu.memory_space<vmem>>, vector<32x384xbf16>
    %c208 = arith.constant 208 : index
    %c0_4 = arith.constant 0 : index
    %4 = vector.load %arg2[%c208, %c0_4] : memref<240x384xbf16, #tpu.memory_space<vmem>>, vector<32x128xbf16>
    %c0_5 = arith.constant 0 : index
    %c0_6 = arith.constant 0 : index
    %5 = vector.load %arg3[%c0_5, %c0_6] : memref<5x384xf32, #tpu.memory_space<vmem>>, vector<1x384xf32>
    %c1 = arith.constant 1 : index
    %c0_7 = arith.constant 0 : index
    %6 = vector.load %arg3[%c1, %c0_7] : memref<5x384xf32, #tpu.memory_space<vmem>>, vector<1x384xf32>
    %7 = vector.shape_cast %6 : vector<1x384xf32> to vector<1x384xf32>
    %8 = vector.broadcast %7 : vector<1x384xf32> to vector<8x384xf32>
    %c2 = arith.constant 2 : index
    %c0_8 = arith.constant 0 : index
    %9 = vector.load %arg3[%c2, %c0_8] : memref<5x384xf32, #tpu.memory_space<vmem>>, vector<1x32xf32>
    %10 = vector.shape_cast %9 : vector<1x32xf32> to vector<1x32xf32>
    %11 = vector.broadcast %10 : vector<1x32xf32> to vector<8x32xf32>
    %c3 = arith.constant 3 : index
    %c0_9 = arith.constant 0 : index
    %12 = vector.load %arg3[%c3, %c0_9] : memref<5x384xf32, #tpu.memory_space<vmem>>, vector<1x32xf32>
    %13 = vector.shape_cast %12 : vector<1x32xf32> to vector<1x32xf32>
    %14 = vector.broadcast %13 : vector<1x32xf32> to vector<8x32xf32>
    %c4 = arith.constant 4 : index
    %c0_10 = arith.constant 0 : index
    %15 = vector.load %arg3[%c4, %c0_10] : memref<5x384xf32, #tpu.memory_space<vmem>>, vector<1x128xf32>
    %c0_11 = arith.constant 0 : index
    %c0_12 = arith.constant 0 : index
    %16 = vector.load %arg0[%c0_11, %c0_12] : memref<64x112xbf16, #tpu.memory_space<vmem>>, vector<64x112xbf16>
    %cst = arith.constant dense<0.000000e+00> : vector<64x384xf32>
    %17 = tpu.matmul %16, %0, %cst {dimension_numbers = #tpu.dot_dimension_numbers<[1], [0], [0], [1], [0, 0, 1, 1], [], []>} : vector<64x112xbf16>, vector<112x384xbf16>, vector<64x384xf32> -> vector<64x384xf32>
    %18 = vector.broadcast %5 : vector<1x384xf32> to vector<64x384xf32>
    %19 = arith.addf %17, %18 : vector<64x384xf32>
    %c0_13 = arith.constant 0 : index
    %c0_14 = arith.constant 0 : index
    %c0_15 = arith.constant 0 : index
    %20 = vector.load %arg1[%c0_13, %c0_14, %c0_15] : memref<2x8x32xf32, #tpu.memory_space<vmem>>, vector<1x8x32xf32>
    %21 = vector.shape_cast %20 : vector<1x8x32xf32> to vector<8x32xf32>
    %c1_16 = arith.constant 1 : index
    %c0_17 = arith.constant 0 : index
    %c0_18 = arith.constant 0 : index
    %22 = vector.load %arg1[%c1_16, %c0_17, %c0_18] : memref<2x8x32xf32, #tpu.memory_space<vmem>>, vector<1x8x32xf32>
    %23 = vector.shape_cast %22 : vector<1x8x32xf32> to vector<8x32xf32>
    %24 = vector.extract_strided_slice %19 {offsets = [0, 0], sizes = [8, 384], strides = [1, 1]} : vector<64x384xf32> to vector<8x384xf32>
    %25 = arith.truncf %21 : vector<8x32xf32> to vector<8x32xbf16>
    %cst_19 = arith.constant dense<0.000000e+00> : vector<8x384xf32>
    %26 = tpu.matmul %25, %1, %cst_19 {dimension_numbers = #tpu.dot_dimension_numbers<[1], [0], [0], [1], [0, 0, 1, 1], [], []>} : vector<8x32xbf16>, vector<32x384xbf16>, vector<8x384xf32> -> vector<8x384xf32>
    %27 = vector.extract_strided_slice %24 {offsets = [0, 0], sizes = [8, 32], strides = [1, 1]} : vector<8x384xf32> to vector<8x32xf32>
    %28 = vector.extract_strided_slice %26 {offsets = [0, 0], sizes = [8, 32], strides = [1, 1]} : vector<8x384xf32> to vector<8x32xf32>
    %29 = arith.addf %27, %28 : vector<8x32xf32>
    %30 = arith.negf %29 : vector<8x32xf32>
    %31 = math.exp %30 : vector<8x32xf32>
    %cst_20 = arith.constant 1.000000e+00 : f32
    %32 = vector.broadcast %cst_20 : f32 to vector<8x32xf32>
    %33 = arith.addf %32, %31 : vector<8x32xf32>
    %34 = arith.divf %32, %33 : vector<8x32xf32>
    %35 = vector.extract_strided_slice %24 {offsets = [0, 128], sizes = [8, 32], strides = [1, 1]} : vector<8x384xf32> to vector<8x32xf32>
    %36 = vector.extract_strided_slice %26 {offsets = [0, 128], sizes = [8, 32], strides = [1, 1]} : vector<8x384xf32> to vector<8x32xf32>
    %37 = arith.addf %35, %36 : vector<8x32xf32>
    %38 = arith.negf %37 : vector<8x32xf32>
    %39 = math.exp %38 : vector<8x32xf32>
    %cst_21 = arith.constant 1.000000e+00 : f32
    %40 = vector.broadcast %cst_21 : f32 to vector<8x32xf32>
    %41 = arith.addf %40, %39 : vector<8x32xf32>
    %42 = arith.divf %40, %41 : vector<8x32xf32>
    %43 = vector.extract_strided_slice %24 {offsets = [0, 256], sizes = [8, 32], strides = [1, 1]} : vector<8x384xf32> to vector<8x32xf32>
    %44 = vector.extract_strided_slice %26 {offsets = [0, 256], sizes = [8, 32], strides = [1, 1]} : vector<8x384xf32> to vector<8x32xf32>
    %45 = arith.addf %44, %11 : vector<8x32xf32>
    %46 = arith.mulf %34, %45 : vector<8x32xf32>
    %47 = arith.addf %43, %46 : vector<8x32xf32>
    %48 = math.tanh %47 : vector<8x32xf32>
    %49 = arith.subf %21, %48 : vector<8x32xf32>
    %50 = arith.mulf %42, %49 : vector<8x32xf32>
    %51 = arith.addf %48, %50 : vector<8x32xf32>
    %52 = vector.extract_strided_slice %19 {offsets = [8, 0], sizes = [8, 384], strides = [1, 1]} : vector<64x384xf32> to vector<8x384xf32>
    %53 = arith.truncf %51 : vector<8x32xf32> to vector<8x32xbf16>
    %cst_22 = arith.constant dense<0.000000e+00> : vector<8x384xf32>
    %54 = tpu.matmul %53, %1, %cst_22 {dimension_numbers = #tpu.dot_dimension_numbers<[1], [0], [0], [1], [0, 0, 1, 1], [], []>} : vector<8x32xbf16>, vector<32x384xbf16>, vector<8x384xf32> -> vector<8x384xf32>
    %55 = vector.extract_strided_slice %52 {offsets = [0, 0], sizes = [8, 32], strides = [1, 1]} : vector<8x384xf32> to vector<8x32xf32>
    %56 = vector.extract_strided_slice %54 {offsets = [0, 0], sizes = [8, 32], strides = [1, 1]} : vector<8x384xf32> to vector<8x32xf32>
    %57 = arith.addf %55, %56 : vector<8x32xf32>
    %58 = arith.negf %57 : vector<8x32xf32>
    %59 = math.exp %58 : vector<8x32xf32>
    %cst_23 = arith.constant 1.000000e+00 : f32
    %60 = vector.broadcast %cst_23 : f32 to vector<8x32xf32>
    %61 = arith.addf %60, %59 : vector<8x32xf32>
    %62 = arith.divf %60, %61 : vector<8x32xf32>
    %63 = vector.extract_strided_slice %52 {offsets = [0, 128], sizes = [8, 32], strides = [1, 1]} : vector<8x384xf32> to vector<8x32xf32>
    %64 = vector.extract_strided_slice %54 {offsets = [0, 128], sizes = [8, 32], strides = [1, 1]} : vector<8x384xf32> to vector<8x32xf32>
    %65 = arith.addf %63, %64 : vector<8x32xf32>
    %66 = arith.negf %65 : vector<8x32xf32>
    %67 = math.exp %66 : vector<8x32xf32>
    %cst_24 = arith.constant 1.000000e+00 : f32
    %68 = vector.broadcast %cst_24 : f32 to vector<8x32xf32>
    %69 = arith.addf %68, %67 : vector<8x32xf32>
    %70 = arith.divf %68, %69 : vector<8x32xf32>
    %71 = vector.extract_strided_slice %52 {offsets = [0, 256], sizes = [8, 32], strides = [1, 1]} : vector<8x384xf32> to vector<8x32xf32>
    %72 = vector.extract_strided_slice %54 {offsets = [0, 256], sizes = [8, 32], strides = [1, 1]} : vector<8x384xf32> to vector<8x32xf32>
    %73 = arith.addf %72, %11 : vector<8x32xf32>
    %74 = arith.mulf %62, %73 : vector<8x32xf32>
    %75 = arith.addf %71, %74 : vector<8x32xf32>
    %76 = math.tanh %75 : vector<8x32xf32>
    %77 = arith.subf %51, %76 : vector<8x32xf32>
    %78 = arith.mulf %70, %77 : vector<8x32xf32>
    %79 = arith.addf %76, %78 : vector<8x32xf32>
    %80 = arith.truncf %51 : vector<8x32xf32> to vector<8x32xbf16>
    %cst_25 = arith.constant dense<0.000000e+00> : vector<8x384xf32>
    %81 = tpu.matmul %80, %2, %cst_25 {dimension_numbers = #tpu.dot_dimension_numbers<[1], [0], [0], [1], [0, 0, 1, 1], [], []>} : vector<8x32xbf16>, vector<32x384xbf16>, vector<8x384xf32> -> vector<8x384xf32>
    %82 = arith.addf %81, %8 : vector<8x384xf32>
    %83 = arith.truncf %23 : vector<8x32xf32> to vector<8x32xbf16>
    %cst_26 = arith.constant dense<0.000000e+00> : vector<8x384xf32>
    %84 = tpu.matmul %83, %3, %cst_26 {dimension_numbers = #tpu.dot_dimension_numbers<[1], [0], [0], [1], [0, 0, 1, 1], [], []>} : vector<8x32xbf16>, vector<32x384xbf16>, vector<8x384xf32> -> vector<8x384xf32>
    %85 = vector.extract_strided_slice %82 {offsets = [0, 0], sizes = [8, 32], strides = [1, 1]} : vector<8x384xf32> to vector<8x32xf32>
    %86 = vector.extract_strided_slice %84 {offsets = [0, 0], sizes = [8, 32], strides = [1, 1]} : vector<8x384xf32> to vector<8x32xf32>
    %87 = arith.addf %85, %86 : vector<8x32xf32>
    %88 = arith.negf %87 : vector<8x32xf32>
    %89 = math.exp %88 : vector<8x32xf32>
    %cst_27 = arith.constant 1.000000e+00 : f32
    %90 = vector.broadcast %cst_27 : f32 to vector<8x32xf32>
    %91 = arith.addf %90, %89 : vector<8x32xf32>
    %92 = arith.divf %90, %91 : vector<8x32xf32>
    %93 = vector.extract_strided_slice %82 {offsets = [0, 128], sizes = [8, 32], strides = [1, 1]} : vector<8x384xf32> to vector<8x32xf32>
    %94 = vector.extract_strided_slice %84 {offsets = [0, 128], sizes = [8, 32], strides = [1, 1]} : vector<8x384xf32> to vector<8x32xf32>
    %95 = arith.addf %93, %94 : vector<8x32xf32>
    %96 = arith.negf %95 : vector<8x32xf32>
    %97 = math.exp %96 : vector<8x32xf32>
    %cst_28 = arith.constant 1.000000e+00 : f32
    %98 = vector.broadcast %cst_28 : f32 to vector<8x32xf32>
    %99 = arith.addf %98, %97 : vector<8x32xf32>
    %100 = arith.divf %98, %99 : vector<8x32xf32>
    %101 = vector.extract_strided_slice %82 {offsets = [0, 256], sizes = [8, 32], strides = [1, 1]} : vector<8x384xf32> to vector<8x32xf32>
    %102 = vector.extract_strided_slice %84 {offsets = [0, 256], sizes = [8, 32], strides = [1, 1]} : vector<8x384xf32> to vector<8x32xf32>
    %103 = arith.addf %102, %14 : vector<8x32xf32>
    %104 = arith.mulf %92, %103 : vector<8x32xf32>
    %105 = arith.addf %101, %104 : vector<8x32xf32>
    %106 = math.tanh %105 : vector<8x32xf32>
    %107 = arith.subf %23, %106 : vector<8x32xf32>
    %108 = arith.mulf %100, %107 : vector<8x32xf32>
    %109 = arith.addf %106, %108 : vector<8x32xf32>
    %110 = vector.extract_strided_slice %19 {offsets = [16, 0], sizes = [8, 384], strides = [1, 1]} : vector<64x384xf32> to vector<8x384xf32>
    %111 = arith.truncf %79 : vector<8x32xf32> to vector<8x32xbf16>
    %cst_29 = arith.constant dense<0.000000e+00> : vector<8x384xf32>
    %112 = tpu.matmul %111, %1, %cst_29 {dimension_numbers = #tpu.dot_dimension_numbers<[1], [0], [0], [1], [0, 0, 1, 1], [], []>} : vector<8x32xbf16>, vector<32x384xbf16>, vector<8x384xf32> -> vector<8x384xf32>
    %113 = vector.extract_strided_slice %110 {offsets = [0, 0], sizes = [8, 32], strides = [1, 1]} : vector<8x384xf32> to vector<8x32xf32>
    %114 = vector.extract_strided_slice %112 {offsets = [0, 0], sizes = [8, 32], strides = [1, 1]} : vector<8x384xf32> to vector<8x32xf32>
    %115 = arith.addf %113, %114 : vector<8x32xf32>
    %116 = arith.negf %115 : vector<8x32xf32>
    %117 = math.exp %116 : vector<8x32xf32>
    %cst_30 = arith.constant 1.000000e+00 : f32
    %118 = vector.broadcast %cst_30 : f32 to vector<8x32xf32>
    %119 = arith.addf %118, %117 : vector<8x32xf32>
    %120 = arith.divf %118, %119 : vector<8x32xf32>
    %121 = vector.extract_strided_slice %110 {offsets = [0, 128], sizes = [8, 32], strides = [1, 1]} : vector<8x384xf32> to vector<8x32xf32>
    %122 = vector.extract_strided_slice %112 {offsets = [0, 128], sizes = [8, 32], strides = [1, 1]} : vector<8x384xf32> to vector<8x32xf32>
    %123 = arith.addf %121, %122 : vector<8x32xf32>
    %124 = arith.negf %123 : vector<8x32xf32>
    %125 = math.exp %124 : vector<8x32xf32>
    %cst_31 = arith.constant 1.000000e+00 : f32
    %126 = vector.broadcast %cst_31 : f32 to vector<8x32xf32>
    %127 = arith.addf %126, %125 : vector<8x32xf32>
    %128 = arith.divf %126, %127 : vector<8x32xf32>
    %129 = vector.extract_strided_slice %110 {offsets = [0, 256], sizes = [8, 32], strides = [1, 1]} : vector<8x384xf32> to vector<8x32xf32>
    %130 = vector.extract_strided_slice %112 {offsets = [0, 256], sizes = [8, 32], strides = [1, 1]} : vector<8x384xf32> to vector<8x32xf32>
    %131 = arith.addf %130, %11 : vector<8x32xf32>
    %132 = arith.mulf %120, %131 : vector<8x32xf32>
    %133 = arith.addf %129, %132 : vector<8x32xf32>
    %134 = math.tanh %133 : vector<8x32xf32>
    %135 = arith.subf %79, %134 : vector<8x32xf32>
    %136 = arith.mulf %128, %135 : vector<8x32xf32>
    %137 = arith.addf %134, %136 : vector<8x32xf32>
    %138 = arith.truncf %79 : vector<8x32xf32> to vector<8x32xbf16>
    %cst_32 = arith.constant dense<0.000000e+00> : vector<8x384xf32>
    %139 = tpu.matmul %138, %2, %cst_32 {dimension_numbers = #tpu.dot_dimension_numbers<[1], [0], [0], [1], [0, 0, 1, 1], [], []>} : vector<8x32xbf16>, vector<32x384xbf16>, vector<8x384xf32> -> vector<8x384xf32>
    %140 = arith.addf %139, %8 : vector<8x384xf32>
    %141 = arith.truncf %109 : vector<8x32xf32> to vector<8x32xbf16>
    %cst_33 = arith.constant dense<0.000000e+00> : vector<8x384xf32>
    %142 = tpu.matmul %141, %3, %cst_33 {dimension_numbers = #tpu.dot_dimension_numbers<[1], [0], [0], [1], [0, 0, 1, 1], [], []>} : vector<8x32xbf16>, vector<32x384xbf16>, vector<8x384xf32> -> vector<8x384xf32>
    %143 = vector.extract_strided_slice %140 {offsets = [0, 0], sizes = [8, 32], strides = [1, 1]} : vector<8x384xf32> to vector<8x32xf32>
    %144 = vector.extract_strided_slice %142 {offsets = [0, 0], sizes = [8, 32], strides = [1, 1]} : vector<8x384xf32> to vector<8x32xf32>
    %145 = arith.addf %143, %144 : vector<8x32xf32>
    %146 = arith.negf %145 : vector<8x32xf32>
    %147 = math.exp %146 : vector<8x32xf32>
    %cst_34 = arith.constant 1.000000e+00 : f32
    %148 = vector.broadcast %cst_34 : f32 to vector<8x32xf32>
    %149 = arith.addf %148, %147 : vector<8x32xf32>
    %150 = arith.divf %148, %149 : vector<8x32xf32>
    %151 = vector.extract_strided_slice %140 {offsets = [0, 128], sizes = [8, 32], strides = [1, 1]} : vector<8x384xf32> to vector<8x32xf32>
    %152 = vector.extract_strided_slice %142 {offsets = [0, 128], sizes = [8, 32], strides = [1, 1]} : vector<8x384xf32> to vector<8x32xf32>
    %153 = arith.addf %151, %152 : vector<8x32xf32>
    %154 = arith.negf %153 : vector<8x32xf32>
    %155 = math.exp %154 : vector<8x32xf32>
    %cst_35 = arith.constant 1.000000e+00 : f32
    %156 = vector.broadcast %cst_35 : f32 to vector<8x32xf32>
    %157 = arith.addf %156, %155 : vector<8x32xf32>
    %158 = arith.divf %156, %157 : vector<8x32xf32>
    %159 = vector.extract_strided_slice %140 {offsets = [0, 256], sizes = [8, 32], strides = [1, 1]} : vector<8x384xf32> to vector<8x32xf32>
    %160 = vector.extract_strided_slice %142 {offsets = [0, 256], sizes = [8, 32], strides = [1, 1]} : vector<8x384xf32> to vector<8x32xf32>
    %161 = arith.addf %160, %14 : vector<8x32xf32>
    %162 = arith.mulf %150, %161 : vector<8x32xf32>
    %163 = arith.addf %159, %162 : vector<8x32xf32>
    %164 = math.tanh %163 : vector<8x32xf32>
    %165 = arith.subf %109, %164 : vector<8x32xf32>
    %166 = arith.mulf %158, %165 : vector<8x32xf32>
    %167 = arith.addf %164, %166 : vector<8x32xf32>
    %168 = vector.extract_strided_slice %19 {offsets = [24, 0], sizes = [8, 384], strides = [1, 1]} : vector<64x384xf32> to vector<8x384xf32>
    %169 = arith.truncf %137 : vector<8x32xf32> to vector<8x32xbf16>
    %cst_36 = arith.constant dense<0.000000e+00> : vector<8x384xf32>
    %170 = tpu.matmul %169, %1, %cst_36 {dimension_numbers = #tpu.dot_dimension_numbers<[1], [0], [0], [1], [0, 0, 1, 1], [], []>} : vector<8x32xbf16>, vector<32x384xbf16>, vector<8x384xf32> -> vector<8x384xf32>
    %171 = vector.extract_strided_slice %168 {offsets = [0, 0], sizes = [8, 32], strides = [1, 1]} : vector<8x384xf32> to vector<8x32xf32>
    %172 = vector.extract_strided_slice %170 {offsets = [0, 0], sizes = [8, 32], strides = [1, 1]} : vector<8x384xf32> to vector<8x32xf32>
    %173 = arith.addf %171, %172 : vector<8x32xf32>
    %174 = arith.negf %173 : vector<8x32xf32>
    %175 = math.exp %174 : vector<8x32xf32>
    %cst_37 = arith.constant 1.000000e+00 : f32
    %176 = vector.broadcast %cst_37 : f32 to vector<8x32xf32>
    %177 = arith.addf %176, %175 : vector<8x32xf32>
    %178 = arith.divf %176, %177 : vector<8x32xf32>
    %179 = vector.extract_strided_slice %168 {offsets = [0, 128], sizes = [8, 32], strides = [1, 1]} : vector<8x384xf32> to vector<8x32xf32>
    %180 = vector.extract_strided_slice %170 {offsets = [0, 128], sizes = [8, 32], strides = [1, 1]} : vector<8x384xf32> to vector<8x32xf32>
    %181 = arith.addf %179, %180 : vector<8x32xf32>
    %182 = arith.negf %181 : vector<8x32xf32>
    %183 = math.exp %182 : vector<8x32xf32>
    %cst_38 = arith.constant 1.000000e+00 : f32
    %184 = vector.broadcast %cst_38 : f32 to vector<8x32xf32>
    %185 = arith.addf %184, %183 : vector<8x32xf32>
    %186 = arith.divf %184, %185 : vector<8x32xf32>
    %187 = vector.extract_strided_slice %168 {offsets = [0, 256], sizes = [8, 32], strides = [1, 1]} : vector<8x384xf32> to vector<8x32xf32>
    %188 = vector.extract_strided_slice %170 {offsets = [0, 256], sizes = [8, 32], strides = [1, 1]} : vector<8x384xf32> to vector<8x32xf32>
    %189 = arith.addf %188, %11 : vector<8x32xf32>
    %190 = arith.mulf %178, %189 : vector<8x32xf32>
    %191 = arith.addf %187, %190 : vector<8x32xf32>
    %192 = math.tanh %191 : vector<8x32xf32>
    %193 = arith.subf %137, %192 : vector<8x32xf32>
    %194 = arith.mulf %186, %193 : vector<8x32xf32>
    %195 = arith.addf %192, %194 : vector<8x32xf32>
    %196 = arith.truncf %137 : vector<8x32xf32> to vector<8x32xbf16>
    %cst_39 = arith.constant dense<0.000000e+00> : vector<8x384xf32>
    %197 = tpu.matmul %196, %2, %cst_39 {dimension_numbers = #tpu.dot_dimension_numbers<[1], [0], [0], [1], [0, 0, 1, 1], [], []>} : vector<8x32xbf16>, vector<32x384xbf16>, vector<8x384xf32> -> vector<8x384xf32>
    %198 = arith.addf %197, %8 : vector<8x384xf32>
    %199 = arith.truncf %167 : vector<8x32xf32> to vector<8x32xbf16>
    %cst_40 = arith.constant dense<0.000000e+00> : vector<8x384xf32>
    %200 = tpu.matmul %199, %3, %cst_40 {dimension_numbers = #tpu.dot_dimension_numbers<[1], [0], [0], [1], [0, 0, 1, 1], [], []>} : vector<8x32xbf16>, vector<32x384xbf16>, vector<8x384xf32> -> vector<8x384xf32>
    %201 = vector.extract_strided_slice %198 {offsets = [0, 0], sizes = [8, 32], strides = [1, 1]} : vector<8x384xf32> to vector<8x32xf32>
    %202 = vector.extract_strided_slice %200 {offsets = [0, 0], sizes = [8, 32], strides = [1, 1]} : vector<8x384xf32> to vector<8x32xf32>
    %203 = arith.addf %201, %202 : vector<8x32xf32>
    %204 = arith.negf %203 : vector<8x32xf32>
    %205 = math.exp %204 : vector<8x32xf32>
    %cst_41 = arith.constant 1.000000e+00 : f32
    %206 = vector.broadcast %cst_41 : f32 to vector<8x32xf32>
    %207 = arith.addf %206, %205 : vector<8x32xf32>
    %208 = arith.divf %206, %207 : vector<8x32xf32>
    %209 = vector.extract_strided_slice %198 {offsets = [0, 128], sizes = [8, 32], strides = [1, 1]} : vector<8x384xf32> to vector<8x32xf32>
    %210 = vector.extract_strided_slice %200 {offsets = [0, 128], sizes = [8, 32], strides = [1, 1]} : vector<8x384xf32> to vector<8x32xf32>
    %211 = arith.addf %209, %210 : vector<8x32xf32>
    %212 = arith.negf %211 : vector<8x32xf32>
    %213 = math.exp %212 : vector<8x32xf32>
    %cst_42 = arith.constant 1.000000e+00 : f32
    %214 = vector.broadcast %cst_42 : f32 to vector<8x32xf32>
    %215 = arith.addf %214, %213 : vector<8x32xf32>
    %216 = arith.divf %214, %215 : vector<8x32xf32>
    %217 = vector.extract_strided_slice %198 {offsets = [0, 256], sizes = [8, 32], strides = [1, 1]} : vector<8x384xf32> to vector<8x32xf32>
    %218 = vector.extract_strided_slice %200 {offsets = [0, 256], sizes = [8, 32], strides = [1, 1]} : vector<8x384xf32> to vector<8x32xf32>
    %219 = arith.addf %218, %14 : vector<8x32xf32>
    %220 = arith.mulf %208, %219 : vector<8x32xf32>
    %221 = arith.addf %217, %220 : vector<8x32xf32>
    %222 = math.tanh %221 : vector<8x32xf32>
    %223 = arith.subf %167, %222 : vector<8x32xf32>
    %224 = arith.mulf %216, %223 : vector<8x32xf32>
    %225 = arith.addf %222, %224 : vector<8x32xf32>
    %226 = vector.extract_strided_slice %19 {offsets = [32, 0], sizes = [8, 384], strides = [1, 1]} : vector<64x384xf32> to vector<8x384xf32>
    %227 = arith.truncf %195 : vector<8x32xf32> to vector<8x32xbf16>
    %cst_43 = arith.constant dense<0.000000e+00> : vector<8x384xf32>
    %228 = tpu.matmul %227, %1, %cst_43 {dimension_numbers = #tpu.dot_dimension_numbers<[1], [0], [0], [1], [0, 0, 1, 1], [], []>} : vector<8x32xbf16>, vector<32x384xbf16>, vector<8x384xf32> -> vector<8x384xf32>
    %229 = vector.extract_strided_slice %226 {offsets = [0, 0], sizes = [8, 32], strides = [1, 1]} : vector<8x384xf32> to vector<8x32xf32>
    %230 = vector.extract_strided_slice %228 {offsets = [0, 0], sizes = [8, 32], strides = [1, 1]} : vector<8x384xf32> to vector<8x32xf32>
    %231 = arith.addf %229, %230 : vector<8x32xf32>
    %232 = arith.negf %231 : vector<8x32xf32>
    %233 = math.exp %232 : vector<8x32xf32>
    %cst_44 = arith.constant 1.000000e+00 : f32
    %234 = vector.broadcast %cst_44 : f32 to vector<8x32xf32>
    %235 = arith.addf %234, %233 : vector<8x32xf32>
    %236 = arith.divf %234, %235 : vector<8x32xf32>
    %237 = vector.extract_strided_slice %226 {offsets = [0, 128], sizes = [8, 32], strides = [1, 1]} : vector<8x384xf32> to vector<8x32xf32>
    %238 = vector.extract_strided_slice %228 {offsets = [0, 128], sizes = [8, 32], strides = [1, 1]} : vector<8x384xf32> to vector<8x32xf32>
    %239 = arith.addf %237, %238 : vector<8x32xf32>
    %240 = arith.negf %239 : vector<8x32xf32>
    %241 = math.exp %240 : vector<8x32xf32>
    %cst_45 = arith.constant 1.000000e+00 : f32
    %242 = vector.broadcast %cst_45 : f32 to vector<8x32xf32>
    %243 = arith.addf %242, %241 : vector<8x32xf32>
    %244 = arith.divf %242, %243 : vector<8x32xf32>
    %245 = vector.extract_strided_slice %226 {offsets = [0, 256], sizes = [8, 32], strides = [1, 1]} : vector<8x384xf32> to vector<8x32xf32>
    %246 = vector.extract_strided_slice %228 {offsets = [0, 256], sizes = [8, 32], strides = [1, 1]} : vector<8x384xf32> to vector<8x32xf32>
    %247 = arith.addf %246, %11 : vector<8x32xf32>
    %248 = arith.mulf %236, %247 : vector<8x32xf32>
    %249 = arith.addf %245, %248 : vector<8x32xf32>
    %250 = math.tanh %249 : vector<8x32xf32>
    %251 = arith.subf %195, %250 : vector<8x32xf32>
    %252 = arith.mulf %244, %251 : vector<8x32xf32>
    %253 = arith.addf %250, %252 : vector<8x32xf32>
    %254 = arith.truncf %195 : vector<8x32xf32> to vector<8x32xbf16>
    %cst_46 = arith.constant dense<0.000000e+00> : vector<8x384xf32>
    %255 = tpu.matmul %254, %2, %cst_46 {dimension_numbers = #tpu.dot_dimension_numbers<[1], [0], [0], [1], [0, 0, 1, 1], [], []>} : vector<8x32xbf16>, vector<32x384xbf16>, vector<8x384xf32> -> vector<8x384xf32>
    %256 = arith.addf %255, %8 : vector<8x384xf32>
    %257 = arith.truncf %225 : vector<8x32xf32> to vector<8x32xbf16>
    %cst_47 = arith.constant dense<0.000000e+00> : vector<8x384xf32>
    %258 = tpu.matmul %257, %3, %cst_47 {dimension_numbers = #tpu.dot_dimension_numbers<[1], [0], [0], [1], [0, 0, 1, 1], [], []>} : vector<8x32xbf16>, vector<32x384xbf16>, vector<8x384xf32> -> vector<8x384xf32>
    %259 = vector.extract_strided_slice %256 {offsets = [0, 0], sizes = [8, 32], strides = [1, 1]} : vector<8x384xf32> to vector<8x32xf32>
    %260 = vector.extract_strided_slice %258 {offsets = [0, 0], sizes = [8, 32], strides = [1, 1]} : vector<8x384xf32> to vector<8x32xf32>
    %261 = arith.addf %259, %260 : vector<8x32xf32>
    %262 = arith.negf %261 : vector<8x32xf32>
    %263 = math.exp %262 : vector<8x32xf32>
    %cst_48 = arith.constant 1.000000e+00 : f32
    %264 = vector.broadcast %cst_48 : f32 to vector<8x32xf32>
    %265 = arith.addf %264, %263 : vector<8x32xf32>
    %266 = arith.divf %264, %265 : vector<8x32xf32>
    %267 = vector.extract_strided_slice %256 {offsets = [0, 128], sizes = [8, 32], strides = [1, 1]} : vector<8x384xf32> to vector<8x32xf32>
    %268 = vector.extract_strided_slice %258 {offsets = [0, 128], sizes = [8, 32], strides = [1, 1]} : vector<8x384xf32> to vector<8x32xf32>
    %269 = arith.addf %267, %268 : vector<8x32xf32>
    %270 = arith.negf %269 : vector<8x32xf32>
    %271 = math.exp %270 : vector<8x32xf32>
    %cst_49 = arith.constant 1.000000e+00 : f32
    %272 = vector.broadcast %cst_49 : f32 to vector<8x32xf32>
    %273 = arith.addf %272, %271 : vector<8x32xf32>
    %274 = arith.divf %272, %273 : vector<8x32xf32>
    %275 = vector.extract_strided_slice %256 {offsets = [0, 256], sizes = [8, 32], strides = [1, 1]} : vector<8x384xf32> to vector<8x32xf32>
    %276 = vector.extract_strided_slice %258 {offsets = [0, 256], sizes = [8, 32], strides = [1, 1]} : vector<8x384xf32> to vector<8x32xf32>
    %277 = arith.addf %276, %14 : vector<8x32xf32>
    %278 = arith.mulf %266, %277 : vector<8x32xf32>
    %279 = arith.addf %275, %278 : vector<8x32xf32>
    %280 = math.tanh %279 : vector<8x32xf32>
    %281 = arith.subf %225, %280 : vector<8x32xf32>
    %282 = arith.mulf %274, %281 : vector<8x32xf32>
    %283 = arith.addf %280, %282 : vector<8x32xf32>
    %284 = vector.extract_strided_slice %19 {offsets = [40, 0], sizes = [8, 384], strides = [1, 1]} : vector<64x384xf32> to vector<8x384xf32>
    %285 = arith.truncf %253 : vector<8x32xf32> to vector<8x32xbf16>
    %cst_50 = arith.constant dense<0.000000e+00> : vector<8x384xf32>
    %286 = tpu.matmul %285, %1, %cst_50 {dimension_numbers = #tpu.dot_dimension_numbers<[1], [0], [0], [1], [0, 0, 1, 1], [], []>} : vector<8x32xbf16>, vector<32x384xbf16>, vector<8x384xf32> -> vector<8x384xf32>
    %287 = vector.extract_strided_slice %284 {offsets = [0, 0], sizes = [8, 32], strides = [1, 1]} : vector<8x384xf32> to vector<8x32xf32>
    %288 = vector.extract_strided_slice %286 {offsets = [0, 0], sizes = [8, 32], strides = [1, 1]} : vector<8x384xf32> to vector<8x32xf32>
    %289 = arith.addf %287, %288 : vector<8x32xf32>
    %290 = arith.negf %289 : vector<8x32xf32>
    %291 = math.exp %290 : vector<8x32xf32>
    %cst_51 = arith.constant 1.000000e+00 : f32
    %292 = vector.broadcast %cst_51 : f32 to vector<8x32xf32>
    %293 = arith.addf %292, %291 : vector<8x32xf32>
    %294 = arith.divf %292, %293 : vector<8x32xf32>
    %295 = vector.extract_strided_slice %284 {offsets = [0, 128], sizes = [8, 32], strides = [1, 1]} : vector<8x384xf32> to vector<8x32xf32>
    %296 = vector.extract_strided_slice %286 {offsets = [0, 128], sizes = [8, 32], strides = [1, 1]} : vector<8x384xf32> to vector<8x32xf32>
    %297 = arith.addf %295, %296 : vector<8x32xf32>
    %298 = arith.negf %297 : vector<8x32xf32>
    %299 = math.exp %298 : vector<8x32xf32>
    %cst_52 = arith.constant 1.000000e+00 : f32
    %300 = vector.broadcast %cst_52 : f32 to vector<8x32xf32>
    %301 = arith.addf %300, %299 : vector<8x32xf32>
    %302 = arith.divf %300, %301 : vector<8x32xf32>
    %303 = vector.extract_strided_slice %284 {offsets = [0, 256], sizes = [8, 32], strides = [1, 1]} : vector<8x384xf32> to vector<8x32xf32>
    %304 = vector.extract_strided_slice %286 {offsets = [0, 256], sizes = [8, 32], strides = [1, 1]} : vector<8x384xf32> to vector<8x32xf32>
    %305 = arith.addf %304, %11 : vector<8x32xf32>
    %306 = arith.mulf %294, %305 : vector<8x32xf32>
    %307 = arith.addf %303, %306 : vector<8x32xf32>
    %308 = math.tanh %307 : vector<8x32xf32>
    %309 = arith.subf %253, %308 : vector<8x32xf32>
    %310 = arith.mulf %302, %309 : vector<8x32xf32>
    %311 = arith.addf %308, %310 : vector<8x32xf32>
    %312 = arith.truncf %253 : vector<8x32xf32> to vector<8x32xbf16>
    %cst_53 = arith.constant dense<0.000000e+00> : vector<8x384xf32>
    %313 = tpu.matmul %312, %2, %cst_53 {dimension_numbers = #tpu.dot_dimension_numbers<[1], [0], [0], [1], [0, 0, 1, 1], [], []>} : vector<8x32xbf16>, vector<32x384xbf16>, vector<8x384xf32> -> vector<8x384xf32>
    %314 = arith.addf %313, %8 : vector<8x384xf32>
    %315 = arith.truncf %283 : vector<8x32xf32> to vector<8x32xbf16>
    %cst_54 = arith.constant dense<0.000000e+00> : vector<8x384xf32>
    %316 = tpu.matmul %315, %3, %cst_54 {dimension_numbers = #tpu.dot_dimension_numbers<[1], [0], [0], [1], [0, 0, 1, 1], [], []>} : vector<8x32xbf16>, vector<32x384xbf16>, vector<8x384xf32> -> vector<8x384xf32>
    %317 = vector.extract_strided_slice %314 {offsets = [0, 0], sizes = [8, 32], strides = [1, 1]} : vector<8x384xf32> to vector<8x32xf32>
    %318 = vector.extract_strided_slice %316 {offsets = [0, 0], sizes = [8, 32], strides = [1, 1]} : vector<8x384xf32> to vector<8x32xf32>
    %319 = arith.addf %317, %318 : vector<8x32xf32>
    %320 = arith.negf %319 : vector<8x32xf32>
    %321 = math.exp %320 : vector<8x32xf32>
    %cst_55 = arith.constant 1.000000e+00 : f32
    %322 = vector.broadcast %cst_55 : f32 to vector<8x32xf32>
    %323 = arith.addf %322, %321 : vector<8x32xf32>
    %324 = arith.divf %322, %323 : vector<8x32xf32>
    %325 = vector.extract_strided_slice %314 {offsets = [0, 128], sizes = [8, 32], strides = [1, 1]} : vector<8x384xf32> to vector<8x32xf32>
    %326 = vector.extract_strided_slice %316 {offsets = [0, 128], sizes = [8, 32], strides = [1, 1]} : vector<8x384xf32> to vector<8x32xf32>
    %327 = arith.addf %325, %326 : vector<8x32xf32>
    %328 = arith.negf %327 : vector<8x32xf32>
    %329 = math.exp %328 : vector<8x32xf32>
    %cst_56 = arith.constant 1.000000e+00 : f32
    %330 = vector.broadcast %cst_56 : f32 to vector<8x32xf32>
    %331 = arith.addf %330, %329 : vector<8x32xf32>
    %332 = arith.divf %330, %331 : vector<8x32xf32>
    %333 = vector.extract_strided_slice %314 {offsets = [0, 256], sizes = [8, 32], strides = [1, 1]} : vector<8x384xf32> to vector<8x32xf32>
    %334 = vector.extract_strided_slice %316 {offsets = [0, 256], sizes = [8, 32], strides = [1, 1]} : vector<8x384xf32> to vector<8x32xf32>
    %335 = arith.addf %334, %14 : vector<8x32xf32>
    %336 = arith.mulf %324, %335 : vector<8x32xf32>
    %337 = arith.addf %333, %336 : vector<8x32xf32>
    %338 = math.tanh %337 : vector<8x32xf32>
    %339 = arith.subf %283, %338 : vector<8x32xf32>
    %340 = arith.mulf %332, %339 : vector<8x32xf32>
    %341 = arith.addf %338, %340 : vector<8x32xf32>
    %342 = vector.extract_strided_slice %19 {offsets = [48, 0], sizes = [8, 384], strides = [1, 1]} : vector<64x384xf32> to vector<8x384xf32>
    %343 = arith.truncf %311 : vector<8x32xf32> to vector<8x32xbf16>
    %cst_57 = arith.constant dense<0.000000e+00> : vector<8x384xf32>
    %344 = tpu.matmul %343, %1, %cst_57 {dimension_numbers = #tpu.dot_dimension_numbers<[1], [0], [0], [1], [0, 0, 1, 1], [], []>} : vector<8x32xbf16>, vector<32x384xbf16>, vector<8x384xf32> -> vector<8x384xf32>
    %345 = vector.extract_strided_slice %342 {offsets = [0, 0], sizes = [8, 32], strides = [1, 1]} : vector<8x384xf32> to vector<8x32xf32>
    %346 = vector.extract_strided_slice %344 {offsets = [0, 0], sizes = [8, 32], strides = [1, 1]} : vector<8x384xf32> to vector<8x32xf32>
    %347 = arith.addf %345, %346 : vector<8x32xf32>
    %348 = arith.negf %347 : vector<8x32xf32>
    %349 = math.exp %348 : vector<8x32xf32>
    %cst_58 = arith.constant 1.000000e+00 : f32
    %350 = vector.broadcast %cst_58 : f32 to vector<8x32xf32>
    %351 = arith.addf %350, %349 : vector<8x32xf32>
    %352 = arith.divf %350, %351 : vector<8x32xf32>
    %353 = vector.extract_strided_slice %342 {offsets = [0, 128], sizes = [8, 32], strides = [1, 1]} : vector<8x384xf32> to vector<8x32xf32>
    %354 = vector.extract_strided_slice %344 {offsets = [0, 128], sizes = [8, 32], strides = [1, 1]} : vector<8x384xf32> to vector<8x32xf32>
    %355 = arith.addf %353, %354 : vector<8x32xf32>
    %356 = arith.negf %355 : vector<8x32xf32>
    %357 = math.exp %356 : vector<8x32xf32>
    %cst_59 = arith.constant 1.000000e+00 : f32
    %358 = vector.broadcast %cst_59 : f32 to vector<8x32xf32>
    %359 = arith.addf %358, %357 : vector<8x32xf32>
    %360 = arith.divf %358, %359 : vector<8x32xf32>
    %361 = vector.extract_strided_slice %342 {offsets = [0, 256], sizes = [8, 32], strides = [1, 1]} : vector<8x384xf32> to vector<8x32xf32>
    %362 = vector.extract_strided_slice %344 {offsets = [0, 256], sizes = [8, 32], strides = [1, 1]} : vector<8x384xf32> to vector<8x32xf32>
    %363 = arith.addf %362, %11 : vector<8x32xf32>
    %364 = arith.mulf %352, %363 : vector<8x32xf32>
    %365 = arith.addf %361, %364 : vector<8x32xf32>
    %366 = math.tanh %365 : vector<8x32xf32>
    %367 = arith.subf %311, %366 : vector<8x32xf32>
    %368 = arith.mulf %360, %367 : vector<8x32xf32>
    %369 = arith.addf %366, %368 : vector<8x32xf32>
    %370 = arith.truncf %311 : vector<8x32xf32> to vector<8x32xbf16>
    %cst_60 = arith.constant dense<0.000000e+00> : vector<8x384xf32>
    %371 = tpu.matmul %370, %2, %cst_60 {dimension_numbers = #tpu.dot_dimension_numbers<[1], [0], [0], [1], [0, 0, 1, 1], [], []>} : vector<8x32xbf16>, vector<32x384xbf16>, vector<8x384xf32> -> vector<8x384xf32>
    %372 = arith.addf %371, %8 : vector<8x384xf32>
    %373 = arith.truncf %341 : vector<8x32xf32> to vector<8x32xbf16>
    %cst_61 = arith.constant dense<0.000000e+00> : vector<8x384xf32>
    %374 = tpu.matmul %373, %3, %cst_61 {dimension_numbers = #tpu.dot_dimension_numbers<[1], [0], [0], [1], [0, 0, 1, 1], [], []>} : vector<8x32xbf16>, vector<32x384xbf16>, vector<8x384xf32> -> vector<8x384xf32>
    %375 = vector.extract_strided_slice %372 {offsets = [0, 0], sizes = [8, 32], strides = [1, 1]} : vector<8x384xf32> to vector<8x32xf32>
    %376 = vector.extract_strided_slice %374 {offsets = [0, 0], sizes = [8, 32], strides = [1, 1]} : vector<8x384xf32> to vector<8x32xf32>
    %377 = arith.addf %375, %376 : vector<8x32xf32>
    %378 = arith.negf %377 : vector<8x32xf32>
    %379 = math.exp %378 : vector<8x32xf32>
    %cst_62 = arith.constant 1.000000e+00 : f32
    %380 = vector.broadcast %cst_62 : f32 to vector<8x32xf32>
    %381 = arith.addf %380, %379 : vector<8x32xf32>
    %382 = arith.divf %380, %381 : vector<8x32xf32>
    %383 = vector.extract_strided_slice %372 {offsets = [0, 128], sizes = [8, 32], strides = [1, 1]} : vector<8x384xf32> to vector<8x32xf32>
    %384 = vector.extract_strided_slice %374 {offsets = [0, 128], sizes = [8, 32], strides = [1, 1]} : vector<8x384xf32> to vector<8x32xf32>
    %385 = arith.addf %383, %384 : vector<8x32xf32>
    %386 = arith.negf %385 : vector<8x32xf32>
    %387 = math.exp %386 : vector<8x32xf32>
    %cst_63 = arith.constant 1.000000e+00 : f32
    %388 = vector.broadcast %cst_63 : f32 to vector<8x32xf32>
    %389 = arith.addf %388, %387 : vector<8x32xf32>
    %390 = arith.divf %388, %389 : vector<8x32xf32>
    %391 = vector.extract_strided_slice %372 {offsets = [0, 256], sizes = [8, 32], strides = [1, 1]} : vector<8x384xf32> to vector<8x32xf32>
    %392 = vector.extract_strided_slice %374 {offsets = [0, 256], sizes = [8, 32], strides = [1, 1]} : vector<8x384xf32> to vector<8x32xf32>
    %393 = arith.addf %392, %14 : vector<8x32xf32>
    %394 = arith.mulf %382, %393 : vector<8x32xf32>
    %395 = arith.addf %391, %394 : vector<8x32xf32>
    %396 = math.tanh %395 : vector<8x32xf32>
    %397 = arith.subf %341, %396 : vector<8x32xf32>
    %398 = arith.mulf %390, %397 : vector<8x32xf32>
    %399 = arith.addf %396, %398 : vector<8x32xf32>
    %400 = vector.extract_strided_slice %19 {offsets = [56, 0], sizes = [8, 384], strides = [1, 1]} : vector<64x384xf32> to vector<8x384xf32>
    %401 = arith.truncf %369 : vector<8x32xf32> to vector<8x32xbf16>
    %cst_64 = arith.constant dense<0.000000e+00> : vector<8x384xf32>
    %402 = tpu.matmul %401, %1, %cst_64 {dimension_numbers = #tpu.dot_dimension_numbers<[1], [0], [0], [1], [0, 0, 1, 1], [], []>} : vector<8x32xbf16>, vector<32x384xbf16>, vector<8x384xf32> -> vector<8x384xf32>
    %403 = vector.extract_strided_slice %400 {offsets = [0, 0], sizes = [8, 32], strides = [1, 1]} : vector<8x384xf32> to vector<8x32xf32>
    %404 = vector.extract_strided_slice %402 {offsets = [0, 0], sizes = [8, 32], strides = [1, 1]} : vector<8x384xf32> to vector<8x32xf32>
    %405 = arith.addf %403, %404 : vector<8x32xf32>
    %406 = arith.negf %405 : vector<8x32xf32>
    %407 = math.exp %406 : vector<8x32xf32>
    %cst_65 = arith.constant 1.000000e+00 : f32
    %408 = vector.broadcast %cst_65 : f32 to vector<8x32xf32>
    %409 = arith.addf %408, %407 : vector<8x32xf32>
    %410 = arith.divf %408, %409 : vector<8x32xf32>
    %411 = vector.extract_strided_slice %400 {offsets = [0, 128], sizes = [8, 32], strides = [1, 1]} : vector<8x384xf32> to vector<8x32xf32>
    %412 = vector.extract_strided_slice %402 {offsets = [0, 128], sizes = [8, 32], strides = [1, 1]} : vector<8x384xf32> to vector<8x32xf32>
    %413 = arith.addf %411, %412 : vector<8x32xf32>
    %414 = arith.negf %413 : vector<8x32xf32>
    %415 = math.exp %414 : vector<8x32xf32>
    %cst_66 = arith.constant 1.000000e+00 : f32
    %416 = vector.broadcast %cst_66 : f32 to vector<8x32xf32>
    %417 = arith.addf %416, %415 : vector<8x32xf32>
    %418 = arith.divf %416, %417 : vector<8x32xf32>
    %419 = vector.extract_strided_slice %400 {offsets = [0, 256], sizes = [8, 32], strides = [1, 1]} : vector<8x384xf32> to vector<8x32xf32>
    %420 = vector.extract_strided_slice %402 {offsets = [0, 256], sizes = [8, 32], strides = [1, 1]} : vector<8x384xf32> to vector<8x32xf32>
    %421 = arith.addf %420, %11 : vector<8x32xf32>
    %422 = arith.mulf %410, %421 : vector<8x32xf32>
    %423 = arith.addf %419, %422 : vector<8x32xf32>
    %424 = math.tanh %423 : vector<8x32xf32>
    %425 = arith.subf %369, %424 : vector<8x32xf32>
    %426 = arith.mulf %418, %425 : vector<8x32xf32>
    %427 = arith.addf %424, %426 : vector<8x32xf32>
    %428 = arith.truncf %369 : vector<8x32xf32> to vector<8x32xbf16>
    %cst_67 = arith.constant dense<0.000000e+00> : vector<8x384xf32>
    %429 = tpu.matmul %428, %2, %cst_67 {dimension_numbers = #tpu.dot_dimension_numbers<[1], [0], [0], [1], [0, 0, 1, 1], [], []>} : vector<8x32xbf16>, vector<32x384xbf16>, vector<8x384xf32> -> vector<8x384xf32>
    %430 = arith.addf %429, %8 : vector<8x384xf32>
    %431 = arith.truncf %399 : vector<8x32xf32> to vector<8x32xbf16>
    %cst_68 = arith.constant dense<0.000000e+00> : vector<8x384xf32>
    %432 = tpu.matmul %431, %3, %cst_68 {dimension_numbers = #tpu.dot_dimension_numbers<[1], [0], [0], [1], [0, 0, 1, 1], [], []>} : vector<8x32xbf16>, vector<32x384xbf16>, vector<8x384xf32> -> vector<8x384xf32>
    %433 = vector.extract_strided_slice %430 {offsets = [0, 0], sizes = [8, 32], strides = [1, 1]} : vector<8x384xf32> to vector<8x32xf32>
    %434 = vector.extract_strided_slice %432 {offsets = [0, 0], sizes = [8, 32], strides = [1, 1]} : vector<8x384xf32> to vector<8x32xf32>
    %435 = arith.addf %433, %434 : vector<8x32xf32>
    %436 = arith.negf %435 : vector<8x32xf32>
    %437 = math.exp %436 : vector<8x32xf32>
    %cst_69 = arith.constant 1.000000e+00 : f32
    %438 = vector.broadcast %cst_69 : f32 to vector<8x32xf32>
    %439 = arith.addf %438, %437 : vector<8x32xf32>
    %440 = arith.divf %438, %439 : vector<8x32xf32>
    %441 = vector.extract_strided_slice %430 {offsets = [0, 128], sizes = [8, 32], strides = [1, 1]} : vector<8x384xf32> to vector<8x32xf32>
    %442 = vector.extract_strided_slice %432 {offsets = [0, 128], sizes = [8, 32], strides = [1, 1]} : vector<8x384xf32> to vector<8x32xf32>
    %443 = arith.addf %441, %442 : vector<8x32xf32>
    %444 = arith.negf %443 : vector<8x32xf32>
    %445 = math.exp %444 : vector<8x32xf32>
    %cst_70 = arith.constant 1.000000e+00 : f32
    %446 = vector.broadcast %cst_70 : f32 to vector<8x32xf32>
    %447 = arith.addf %446, %445 : vector<8x32xf32>
    %448 = arith.divf %446, %447 : vector<8x32xf32>
    %449 = vector.extract_strided_slice %430 {offsets = [0, 256], sizes = [8, 32], strides = [1, 1]} : vector<8x384xf32> to vector<8x32xf32>
    %450 = vector.extract_strided_slice %432 {offsets = [0, 256], sizes = [8, 32], strides = [1, 1]} : vector<8x384xf32> to vector<8x32xf32>
    %451 = arith.addf %450, %14 : vector<8x32xf32>
    %452 = arith.mulf %440, %451 : vector<8x32xf32>
    %453 = arith.addf %449, %452 : vector<8x32xf32>
    %454 = math.tanh %453 : vector<8x32xf32>
    %455 = arith.subf %399, %454 : vector<8x32xf32>
    %456 = arith.mulf %448, %455 : vector<8x32xf32>
    %457 = arith.addf %454, %456 : vector<8x32xf32>
    %458 = arith.truncf %427 : vector<8x32xf32> to vector<8x32xbf16>
    %cst_71 = arith.constant dense<0.000000e+00> : vector<8x384xf32>
    %459 = tpu.matmul %458, %2, %cst_71 {dimension_numbers = #tpu.dot_dimension_numbers<[1], [0], [0], [1], [0, 0, 1, 1], [], []>} : vector<8x32xbf16>, vector<32x384xbf16>, vector<8x384xf32> -> vector<8x384xf32>
    %460 = arith.addf %459, %8 : vector<8x384xf32>
    %461 = arith.truncf %457 : vector<8x32xf32> to vector<8x32xbf16>
    %cst_72 = arith.constant dense<0.000000e+00> : vector<8x384xf32>
    %462 = tpu.matmul %461, %3, %cst_72 {dimension_numbers = #tpu.dot_dimension_numbers<[1], [0], [0], [1], [0, 0, 1, 1], [], []>} : vector<8x32xbf16>, vector<32x384xbf16>, vector<8x384xf32> -> vector<8x384xf32>
    %463 = vector.extract_strided_slice %460 {offsets = [0, 0], sizes = [8, 32], strides = [1, 1]} : vector<8x384xf32> to vector<8x32xf32>
    %464 = vector.extract_strided_slice %462 {offsets = [0, 0], sizes = [8, 32], strides = [1, 1]} : vector<8x384xf32> to vector<8x32xf32>
    %465 = arith.addf %463, %464 : vector<8x32xf32>
    %466 = arith.negf %465 : vector<8x32xf32>
    %467 = math.exp %466 : vector<8x32xf32>
    %cst_73 = arith.constant 1.000000e+00 : f32
    %468 = vector.broadcast %cst_73 : f32 to vector<8x32xf32>
    %469 = arith.addf %468, %467 : vector<8x32xf32>
    %470 = arith.divf %468, %469 : vector<8x32xf32>
    %471 = vector.extract_strided_slice %460 {offsets = [0, 128], sizes = [8, 32], strides = [1, 1]} : vector<8x384xf32> to vector<8x32xf32>
    %472 = vector.extract_strided_slice %462 {offsets = [0, 128], sizes = [8, 32], strides = [1, 1]} : vector<8x384xf32> to vector<8x32xf32>
    %473 = arith.addf %471, %472 : vector<8x32xf32>
    %474 = arith.negf %473 : vector<8x32xf32>
    %475 = math.exp %474 : vector<8x32xf32>
    %cst_74 = arith.constant 1.000000e+00 : f32
    %476 = vector.broadcast %cst_74 : f32 to vector<8x32xf32>
    %477 = arith.addf %476, %475 : vector<8x32xf32>
    %478 = arith.divf %476, %477 : vector<8x32xf32>
    %479 = vector.extract_strided_slice %460 {offsets = [0, 256], sizes = [8, 32], strides = [1, 1]} : vector<8x384xf32> to vector<8x32xf32>
    %480 = vector.extract_strided_slice %462 {offsets = [0, 256], sizes = [8, 32], strides = [1, 1]} : vector<8x384xf32> to vector<8x32xf32>
    %481 = arith.addf %480, %14 : vector<8x32xf32>
    %482 = arith.mulf %470, %481 : vector<8x32xf32>
    %483 = arith.addf %479, %482 : vector<8x32xf32>
    %484 = math.tanh %483 : vector<8x32xf32>
    %485 = arith.subf %457, %484 : vector<8x32xf32>
    %486 = arith.mulf %478, %485 : vector<8x32xf32>
    %487 = arith.addf %484, %486 : vector<8x32xf32>
    %c0_75 = arith.constant 0 : index
    %c0_76 = arith.constant 0 : index
    %c0_77 = arith.constant 0 : index
    %488 = vector.load %arg5[%c0_75, %c0_76, %c0_77] : memref<2x8x32xf32, #tpu.memory_space<vmem>>, vector<1x8x32xf32>
    %489 = vector.shape_cast %488 : vector<1x8x32xf32> to vector<8x32xf32>
    %490 = vector.shape_cast %427 : vector<8x32xf32> to vector<1x8x32xf32>
    tpu.vector_store %arg5[%c0_75, %c0_76, %c0_77], %490 {strides = array<i32>} : memref<2x8x32xf32, #tpu.memory_space<vmem>>, vector<1x8x32xf32>,
    %c1_78 = arith.constant 1 : index
    %c0_79 = arith.constant 0 : index
    %c0_80 = arith.constant 0 : index
    %491 = vector.load %arg5[%c1_78, %c0_79, %c0_80] : memref<2x8x32xf32, #tpu.memory_space<vmem>>, vector<1x8x32xf32>
    %492 = vector.shape_cast %491 : vector<1x8x32xf32> to vector<8x32xf32>
    %493 = vector.shape_cast %487 : vector<8x32xf32> to vector<1x8x32xf32>
    tpu.vector_store %arg5[%c1_78, %c0_79, %c0_80], %493 {strides = array<i32>} : memref<2x8x32xf32, #tpu.memory_space<vmem>>, vector<1x8x32xf32>,
    %494 = tpu.concatenate %109, %167, %225, %283, %341, %399, %457, %487 in 0 : vector<8x32xf32>, vector<8x32xf32>, vector<8x32xf32>, vector<8x32xf32>, vector<8x32xf32>, vector<8x32xf32>, vector<8x32xf32>, vector<8x32xf32> -> vector<64x32xf32>
    %495 = arith.truncf %494 : vector<64x32xf32> to vector<64x32xbf16>
    %cst_81 = arith.constant dense<0.000000e+00> : vector<64x128xf32>
    %496 = tpu.matmul %495, %4, %cst_81 {dimension_numbers = #tpu.dot_dimension_numbers<[1], [0], [0], [1], [0, 0, 1, 1], [], []>} : vector<64x32xbf16>, vector<32x128xbf16>, vector<64x128xf32> -> vector<64x128xf32>
    %497 = vector.broadcast %15 : vector<1x128xf32> to vector<64x128xf32>
    %498 = arith.addf %496, %497 : vector<64x128xf32>
    %499 = vector.shape_cast %498 : vector<64x128xf32> to vector<8x8x128xf32>
    %cst_82 = arith.constant dense<0xFF800000> : vector<8x128xf32>
    %500 = vector.multi_reduction <maximumf>, %499, %cst_82 [0] : vector<8x8x128xf32> to vector<8x128xf32>
    %501 = vector.shape_cast %500 : vector<8x128xf32> to vector<1x8x128xf32>
    %502 = vector.broadcast %501 : vector<1x8x128xf32> to vector<8x8x128xf32>
    %503 = arith.subf %499, %502 : vector<8x8x128xf32>
    %504 = math.exp %503 : vector<8x8x128xf32>
    %cst_83 = arith.constant dense<0.000000e+00> : vector<8x128xf32>
    %505 = vector.multi_reduction <add>, %504, %cst_83 [0] : vector<8x8x128xf32> to vector<8x128xf32>
    %506 = vector.shape_cast %505 : vector<8x128xf32> to vector<1x8x128xf32>
    %507 = math.log %506 : vector<1x8x128xf32>
    %508 = vector.broadcast %507 : vector<1x8x128xf32> to vector<8x8x128xf32>
    %509 = arith.subf %503, %508 : vector<8x8x128xf32>
    %c0_84 = arith.constant 0 : index
    %c0_85 = arith.constant 0 : index
    %c0_86 = arith.constant 0 : index
    %510 = vector.load %arg4[%c0_84, %c0_85, %c0_86] : memref<8x8x128xf32, #tpu.memory_space<vmem>>, vector<8x8x128xf32>
    tpu.vector_store %arg4[%c0_84, %c0_85, %c0_86], %509 {strides = array<i32>} : memref<8x8x128xf32, #tpu.memory_space<vmem>>, vector<8x8x128xf32>,
    return
  }
}

</mosaic_0001>

<bundles_post_ra>
// kernel: generator_forward.1
= control target key start
LH: loop header
LB: loop body
LE: loop exit
PB: predicated region body
PF: predicated region fallthrough
CT: control target
= control target key end

     0   :  { %v4745_v4 = vmov 0   ;;  %vm255_vm0 = vcmask 916480   ;;  %s4739_s0 = inlined_call_operand.vmem [shape: bf16[64,112], index: 0, kind: input, shape index: {}]   ;;  %s4740_s1 = inlined_call_operand.vmem [shape: f32[2,8,32], index: 1, kind: input, shape index: {}]   ;;  %s4741_s2 = inlined_call_operand.vmem [shape: bf16[240,384], index: 2, kind: input, shape index: {}]   ;;  %s4742_s3 = inlined_call_operand.vmem [shape: f32[5,384], index: 3, kind: input, shape index: {}]   ;;  %s4743_s4 = inlined_call_operand.vmem [shape: f32[8,8,128], index: 4, kind: output, shape index: {0}]   ;;  %s4744_s5 = inlined_call_operand.hbm [shape: f32[2,8,32], index: 5, kind: output, shape index: {1}]  }
   0x1   :  { %v3534_v0 = vld [vmem:[%s4741_s2 + $0x8] ss:$12 sps:$4 sm:$0xff]   ;;  %v3535_v1 = vld [vmem:[%s4741_s2 + $0x20] ss:$12 sps:$4 sm:$0xff]   ;;  %v3537_v2 = vld [vmem:[%s4741_s2 + $0x4] ss:$12 sps:$4 sm:$0xff]   ;;  %300 = vmatprep.mubr.bf16.mxu0 %v4745_v4 }
   0x2   :  { %3254 = vmatprep.subr.bf16.mxu1 %v3534_v0  ;;  %v3536_v3 = vld [vmem:[%s4741_s2 + $0x38] ss:$12 sps:$4 sm:$0xff]   ;;  %268 = vmatprep.subr.bf16.mxu0 %v3537_v2  ;;  %v3540_v5 = vld [vmem:[%s4741_s2] ss:$12 sps:$4 sm:$0xff]   ;;  %v3541_v6 = vld [vmem:[%s4741_s2 + $0x1c] ss:$12 sps:$4 sm:$0xff]  }
   0x3   :  { %3255 = vmatpush3.bf16.msra.mxu1 %v3534_v0  ;;  %v3539_v7 = vld [vmem:[%s4741_s2 + $0x50] ss:$12 sps:$4 sm:$0xff]   ;;  %269 = vmatpush1.bf16.msra.mxu0 %v3540_v5  ;;  %v3544_v8 = vld [vmem:[%s4741_s2 + $0x18] ss:$12 sps:$4 sm:$0xff]   ;;  %v3545_v9 = vld [vmem:[%s4741_s2 + $0x34] ss:$12 sps:$4 sm:$0xff]  }
   0x4   :  { %3256 = vmatprep.subr.bf16.mxu1 %v3535_v1  ;;  %270 = vmatprep.subr.bf16.mxu0 %v3541_v6  ;;  %v3543_v10 = vld [vmem:[%s4741_s2 + $0x68] ss:$12 sps:$4 sm:$0xff]   ;;  %v3548_v11 = vld [vmem:[%s4741_s2 + $0x30] ss:$12 sps:$4 sm:$0xff]   ;;  %v3549_v12 = vld [vmem:[%s4741_s2 + $0x4c] ss:$12 sps:$4 sm:$0xff]  }
   0x5   :  { %v3553_v13 = vld [vmem:[%s4739_s0] sm:$0xff]   ;;  %v3552_v14 = vld [vmem:[%s4741_s2 + $0x48] ss:$12 sps:$4 sm:$0xff]   ;;  %v3912_v20 = vld [vmem:[%s4741_s2 + $0xac] ss:$12 sps:$4 sm:$0xff]  }
   0x6   :  { %v3547_v15 = vld [vmem:[%s4741_s2 + $0x80] ss:$12 sps:$4 sm:$0xff]   ;;  %v3554_v16 = vld [vmem:[%s4741_s2 + $0x64] ss:$12 sps:$4 sm:$0xff]   ;;  %3268 = vmatprep.mubr.msk.bf16.mxu1 %vm255_vm0, %v3553_v13  ;;  %v3561_v19 = vld [vmem:[%s4741_s2 + $0x7c] ss:$12 sps:$4 sm:$0xff]  }
   0x7   :  { %3257 = vmatpush3.bf16.msra.mxu1 %v3535_v1  ;;  %271 = vmatpush1.bf16.msra.mxu0 %v3544_v8  ;;  %v3551_v17 = vld [vmem:[%s4741_s2 + $0x98] ss:$12 sps:$4 sm:$0xff]   ;;  %v3559_v18 = vld [vmem:[%s4741_s2 + $0x60] ss:$12 sps:$4 sm:$0xff]   ;;  %v3926_v24 = vld [vmem:[%s4741_s2 + $0xa8] ss:$12 sps:$4 sm:$0xff]  }
   0x8   :  { %3258 = vmatprep.subr.bf16.mxu1 %v3536_v3  ;;  %272 = vmatprep.subr.bf16.mxu0 %v3545_v9  ;;  %v3563_v21 = vld [vmem:[%s4741_s2 + $0x78] ss:$12 sps:$4 sm:$0xff]   ;;  %v3556_v22 = vld [vmem:[%s4739_s0 + $0x8] sm:$0xff]   ;;  %v3565_v23 = vld [vmem:[%s4741_s2 + $0x94] ss:$12 sps:$4 sm:$0xff]  }
   0x9   :  { %v3564_v25 = vld [vmem:[%s4739_s0 + $0x10] sm:$0xff]   ;;  %v3943_v28 = vld [vmem:[%s4741_s2 + $0xc0] ss:$12 sps:$4 sm:$0xff]  }
   0xa   :  { %v3934_v26 = vld [vmem:[%s4741_s2 + $0xc4] ss:$12 sps:$4 sm:$0xff]  }
   0xb   :  { %3259 = vmatpush3.bf16.msra.mxu1 %v3536_v3  ;;  %273 = vmatpush1.bf16.msra.mxu0 %v3548_v11  ;;  %v3570_v27 = vld [vmem:[%s4741_s2 + $0x90] ss:$12 sps:$4 sm:$0xff]  }
   0xc   :  { %3260 = vmatprep.subr.bf16.mxu1 %v3539_v7  ;;  %274 = vmatprep.subr.bf16.mxu0 %v3549_v12 }
   0xf   :  { %3261 = vmatpush3.bf16.msra.mxu1 %v3539_v7  ;;  %275 = vmatpush1.bf16.msra.mxu0 %v3552_v14 }
  0x10   :  { %3262 = vmatprep.subr.bf16.mxu1 %v3543_v10  ;;  %276 = vmatprep.subr.bf16.mxu0 %v3554_v16 }
  0x13   :  { %3263 = vmatpush3.bf16.msra.mxu1 %v3543_v10  ;;  %277 = vmatpush1.bf16.msra.mxu0 %v3559_v18 }
  0x14   :  { %3264 = vmatprep.subr.bf16.mxu1 %v3547_v15  ;;  %278 = vmatprep.subr.bf16.mxu0 %v3561_v19 }
  0x17   :  { %3265 = vmatpush3.bf16.msra.mxu1 %v3547_v15  ;;  %279 = vmatpush1.bf16.msra.mxu0 %v3563_v21 }
  0x18   :  { %3266 = vmatprep.subr.bf16.mxu1 %v3551_v17  ;;  %280 = vmatprep.subr.bf16.mxu0 %v3565_v23 }
  0x1b   :  { %3267 = vmatpush3.bf16.msra.mxu1 %v3551_v17  ;;  %281 = vmatpush1.bf16.msra.mxu0 %v3570_v27 }
  0x1c   :  { %446 = vmatprep.subr.bf16.mxu1 %v3912_v20 }
  0x1e   :  { %3269 = vmatmul.mubr.msk.bf16.vlgmr.msra.gmra.mrb[0].mxu1 %vm255_vm0, %v3556_v22 }
  0x1f   :  { %447 = vmatpush1.bf16.msra.mxu1 %v3926_v24  ;;  %3272 = vmatprep.mubr.msk.bf16.mxu1 %vm255_vm0, %v3564_v25 }
  0x20   :  { %448 = vmatprep.subr.bf16.mxu1 %v3934_v26 }
  0x21   :  { %11 = vsyncpa [#allocation3], 0  ;;  %v3567_v29 = vld [vmem:[%s4739_s0 + $0x18] sm:$0xff]   ;;  %3052 = vmatmul.mubr.msk.bf16.vlgmr.msra.gmra.mrb[0].mxu0 %vm255_vm0, %v3553_v13  ;;  %v4747_v30 = vmov 0.0   ;;  %v3961_v31 = vld [vmem:[%s4740_s1] sm:$0xff]  ;;  %vm442_vm1 = vcmask 261120   ;;  %v81_v40 = vlaneseq }
  0x22   :  { %310 = vmatprep.mubr.bf16.mxu0 %v4745_v4  ;;  %v409_v32 = vpack.c.bf16 %v3961_v31, %v3961_v31  ;;  %v3968_v33 = vld [vmem:[%s4741_s2 + $0xb0] ss:$12 sps:$4 sm:$0xff]   ;;  %v3977_v34 = vld [vmem:[%s4741_s2 + $0xc8] ss:$12 sps:$4 sm:$0xff]   ;;  %vm3816_vm2 = vmmov 0  }
  0x23   :  { %449 = vmatpush1.bf16.msra.mxu1 %v3943_v28  ;;  %v3997_v35 = vld [vmem:[%s4741_s2 + $0xdc] ss:$12 sps:$4 sm:$0xff]   ;;  %v4002_v36 = vld [vmem:[%s4741_s2 + $0xd8] ss:$12 sps:$4 sm:$0xff]   ;;  %v4008_v37 = vld [vmem:[%s4741_s2 + $0xf4] ss:$12 sps:$4 sm:$0xff]  }
  0x24   :  { %3276 = vmatprep.subr.bf16.mxu1 %v4747_v30  ;;  %686 = vmatprep.subr.bf16.mxu0 %v3997_v35  ;;  %v4014_v38 = vld [vmem:[%s4741_s2 + $0xf0] ss:$12 sps:$4 sm:$0xff]   ;;  %v4021_v39 = vld [vmem:[%s4741_s2 + $0x10c] ss:$12 sps:$4 sm:$0xff]   ;;  %v4024_v41 = vshrl.u32 %v81_v40, 7 }
  0x25   :  { %687 = vmatpush1.bf16.msra.mxu0 %v4002_v36  ;;  %v77_v43 = vld [vmem:[%s4742_s3] ss:$8 sm:$0x7] }
  0x26   :  { %3273 = vmatmul.mubr.msk.bf16.gmra.mrb[4].mxu1 %vm255_vm0, %v3567_v29  ;;  %688 = vmatprep.subr.bf16.mxu0 %v4008_v37  ;;  %v4749_v42 = vsub.s32 2, %v4024_v41  ;;  %v83_v46 = vsub.s32 0, %v4024_v41  ;;  %v87_v55 = vsub.s32 1, %v4024_v41 }
  0x27   :  { %478 = vmatprep.mubr.bf16.mxu1 %v4745_v4 }
  0x28   :  { %v4032_v44 = vrot.slane %v77_v43, %v4749_v42  ;;  %v111_v53 = vrot.slane %v77_v43, %v83_v46  ;;  %v4059_v1 = vrot.slane %v77_v43, %v87_v55 }
  0x29   :  { %3053 = vmatmul.mubr.msk.bf16.gmra.mrb[4].mxu0 %vm255_vm0, %v3556_v22 }
  0x2a   :  { %320 = vmatprep.mubr.bf16.mxu0 %v4745_v4  ;;  %689 = vmatpush1.bf16.msra.mxu0 %v4014_v38 }
  0x2b   :  { %803 = vmatprep.subr.bf16.mxu0 %v4021_v39 }
  0x2e   :  { %3067 = vmatmul.mubr.msk.bf16.vlgmr.msra.gmra.mrb[8].mxu1 %vm442_vm1, %v409_v32 }
  0x2f   :  { %3277 = vmatpush3.bf16.msra.mxu1 %v3968_v33  ;;  %3280 = vmatprep.mubr.msk.bf16.mxu1 %vm3816_vm2, %v4747_v30 }
  0x30   :  { %3278 = vmatprep.subr.bf16.mxu1 %v4747_v30 }
  0x31   :  { %3054 = vmatmul.mubr.msk.bf16.gmra.mrb[8].mxu0 %vm255_vm0, %v3564_v25 }
  0x32   :  { %330 = vmatprep.mubr.bf16.mxu0 %v4745_v4 }
  0x33   :  { %3279 = vmatpush3.bf16.msra.mxu1 %v3977_v34 }
  0x34   :  { %552 = vmatprep.subr.bf16.mxu1 %v3912_v20 }
  0x36   :  { %3281 = vmatmul.mubr.msk.bf16.vlgmr.msra.gmra.mrb[12].mxu1 %vm442_vm1, %v409_v32 }
  0x37   :  { %553 = vmatpush1.bf16.msra.mxu1 %v3926_v24  ;;  %584 = vmatprep.mubr.bf16.mxu1 %v4745_v4 }
  0x38   :  { %554 = vmatprep.subr.bf16.mxu1 %v3934_v26 }
  0x39   :  { %3055 = vmatmul.mubr.msk.bf16.gmra.mrb[12].mxu0 %vm255_vm0, %v3567_v29 }
  0x3a   :  { %718 = vmatprep.mubr.bf16.mxu0 %v4745_v4 }
  0x3b   :  { %555 = vmatpush1.bf16.msra.mxu1 %v3943_v28 }
  0x3c   :  { %3284 = vmatprep.subr.bf16.mxu1 %v4747_v30 }
  0xf1   :  { %v3270_v45 = vpop.f32.mrb[0].mxu1 }
  0xf2   :  { %v4036_v47 = vadd.f32 %v3270_v45, %v4032_v44  ;;  %v375_v48 = vpop.f32.mrb[1].mxu1 }
  0xf3   :  { %v3271_v49 = vpop.f32.mrb[2].mxu1 }
  0xf4   :  { %v4039_v50 = vadd.f32 %v3271_v49, %v4032_v44  ;;  %v378_v51 = vpop.f32.mrb[3].mxu1  ;;  %v302_v54 = vpop.f32.mrb[0].mxu0 }
  0xf5   :  { %v4042_v52 = vadd.f32 %v378_v51, %v4032_v44  ;;  %v304_v56 = vpop.f32.mrb[1].mxu0  ;;  %v303_v6 = vadd.f32 %v302_v54, %v111_v53 }
  0xf6   :  { %v306_v57 = vpop.f32.mrb[2].mxu0  ;;  %v305_v8 = vadd.f32 %v304_v56, %v4059_v1 }
  0xf7   :  { %v4047_v59 = vadd.f32 %v306_v57, %v111_v53  ;;  %v4049_v60 = vpop.f32.mrb[3].mxu0 }
  0xf9   :  { %v3274_v58 = vpop.f32.mrb[4].mxu1 }
  0xfa   :  { %v4052_v61 = vadd.f32 %v3274_v58, %v4032_v44  ;;  %v391_v62 = vpop.f32.mrb[5].mxu1 }
  0xfb   :  { %v4055_v63 = vadd.f32 %v391_v62, %v4032_v44  ;;  %v3275_v0 = vpop.f32.mrb[6].mxu1 }
  0xfc   :  { %v4062_v2 = vadd.f32 %v3275_v0, %v4032_v44  ;;  %v394_v3 = vpop.f32.mrb[7].mxu1  ;;  %v312_v7 = vpop.f32.mrb[4].mxu0 }
  0xfd   :  { %v4065_v5 = vadd.f32 %v394_v3, %v4032_v44  ;;  %v4068_v9 = vadd.f32 %v312_v7, %v111_v53  ;;  %v4070_v10 = vpop.f32.mrb[5].mxu0 }
  0xfe   :  { %4750 = vst [vmem:[#allocation5_spill] sm:$0xff] %v4062_v2  ;;  %v316_v11 = vpop.f32.mrb[6].mxu0 }
  0xff   :  { %v4072_v13 = vadd.f32 %v316_v11, %v111_v53  ;;  %v4074_v14 = vpop.f32.mrb[7].mxu0 }
 0x101   :  { %v480_v12 = vpop.f32.mrb[8].mxu1 }
 0x102   :  { %v527_v15 = vadd.f32 %v480_v12, %v303_v6  ;;  %v482_v16 = vpop.f32.mrb[9].mxu1  ;;  %v4093_v6 = vld [vmem:[%s4742_s3 + $0x2] ss:$0 sm:$0xff]  ;;  %v376_v12 = vadd.f32 %v375_v48, %v4032_v44  ;;  %v4110_v48 = vld [vmem:[%s4741_s2 + $0x124] ss:$12 sps:$4 sm:$0xff]  }
 0x103   :  { %v534_v17 = vadd.f32 %v482_v16, %v305_v8  ;;  %v484_v18 = vpop.f32.mrb[10].mxu1 }
 0x104   :  { %v3069_v19 = vmul.f32 -1.442695, %v527_v15  ;;  %v485_v21 = vpop.f32.mrb[11].mxu1  ;;  %v322_v22 = vpop.f32.mrb[8].mxu0 }
 0x105   :  { %v4076_v23 = vadd.f32 %v322_v22, %v111_v53  ;;  %v4078_v25 = vpop.f32.mrb[9].mxu0  ;;  %v3070_v51 = vmul.f32 -1.442695, %v534_v17 }
 0x106   :  { %3592 = vpow2.f32 %v3069_v19  ;;  %v326_v27 = vpop.f32.mrb[10].mxu0 }
 0x107   :  { %v4080_v32 = vadd.f32 %v326_v27, %v111_v53  ;;  %v4082_v40 = vpop.f32.mrb[11].mxu0  ;;  %3594 = vpow2.f32 %v3070_v51  ;;  %v4103_v27 = vld [vmem:[%s4741_s2 + $0x108] ss:$12 sps:$4 sm:$0xff]   ;;  %v4157_v51 = vld [vmem:[%s4741_s2 + $0x110] ss:$12 sps:$4 sm:$0xff]  }
 0x109   :  { %v521_v29 = vpop.f32.mrb[12].mxu1 }
 0x10a   :  { %v3282_v43 = vpop.f32.mrb[13].mxu1  ;;  %v541_v7 = vadd.f32 %v521_v29, %v4093_v6  ;;  %v4130_v29 = vld [vmem:[%s4741_s2 + $0xe0] ss:$12 sps:$4 sm:$0xff]  }
 0x10b   :  { %v524_v45 = vpop.f32.mrb[14].mxu1  ;;  %v4136_v43 = vld [vmem:[%s4740_s1 + $0x8] sm:$0xff] }
 0x10c   :  { %v3283_v49 = vpop.f32.mrb[15].mxu1  ;;  %v332_v54 = vpop.f32.mrb[12].mxu0  ;;  %v767_v45 = vpack.c.bf16 %v4136_v43, %v4136_v43 }
 0x10d   :  { %v4084_v56 = vadd.f32 %v332_v54, %v111_v53  ;;  %v4086_v57 = vpop.f32.mrb[13].mxu0  ;;  %v4147_v49 = vld [vmem:[%s4741_s2 + $0xf8] ss:$12 sps:$4 sm:$0xff]   ;;  %v4168_v54 = vld [vmem:[%s4741_s2 + $0x128] ss:$12 sps:$4 sm:$0xff]  }
 0x10e   :  { %v336_v62 = vpop.f32.mrb[14].mxu0 }
 0x10f   :  { %v4088_v3 = vadd.f32 %v336_v62, %v111_v53  ;;  %v309_v62 = vadd.f32 %v4049_v60, %v4059_v1 }
 0x110   :  { %v3593_v58 = vpop.eup %3592 }
 0x111   :  { %v531_v0 = vadd.f32 1.0, %v3593_v58  ;;  %4751 = vst [vmem:[#allocation6_spill] sm:$0xff] %v4088_v3  ;;  %v3595_v8 = vpop.eup %3594  ;;  %v4184_v58 = vpop.f32.mrb[15].mxu0 }
 0x112   :  { %v538_v16 = vadd.f32 1.0, %v3595_v8 }
 0x113   :  { %3596 = vrcp.f32 %v531_v0 }
 0x11d   :  { %v3597_v11 = vpop.eup %3596 }
 0x11e   :  { %v542_v15 = vmul.f32 %v3597_v11, %v541_v7 }
 0x120   :  { %v543_v17 = vadd.f32 %v542_v15, %v376_v12 }
 0x122   :  { %3598 = vtanh.f32 %v543_v17  ;;  %v3026_v17 = vld [vmem:[%s4742_s3 + $0x1] ss:$8 sm:$0x7] }
 0x123   :  { %3600 = vrcp.f32 %v538_v16 }
 0x12c   :  { %v3599_v53 = vpop.eup %3598 }
 0x12d   :  { %v545_v18 = vsub.f32 %v3961_v31, %v3599_v53  ;;  %v3601_v19 = vpop.eup %3600  ;;  %v4119_v31 = vld [vmem:[%s4741_s2 + $0x120] ss:$12 sps:$4 sm:$0xff]  }
 0x12f   :  { %v546_v21 = vmul.f32 %v3601_v19, %v545_v18  ;;  %v4194_v19 = vrot.slane %v3026_v17, %v83_v46 }
 0x131   :  { %v4098_v22 = vadd.f32 %v3599_v53, %v546_v21 }
 0x133   :  { %v548_v44 = vpack.c.bf16 %v4098_v22, %v4098_v22 }
 0x135   :  { %3071 = vmatmul.mubr.msk.bf16.vlgmr.msra.gmra.mrb[16].mxu1 %vm442_vm1, %v548_v44  ;;  %3081 = vmatmul.mubr.msk.bf16.vlgmr.msra.gmra.mrb[16].mxu0 %vm442_vm1, %v548_v44 }
 0x136   :  { %3285 = vmatpush3.bf16.msra.mxu1 %v3968_v33  ;;  %804 = vmatpush1.bf16.msra.mxu0 %v4103_v27 }
 0x137   :  { %3286 = vmatprep.subr.bf16.mxu1 %v4747_v30  ;;  %3288 = vmatprep.mubr.msk.bf16.mxu1 %vm3816_vm2, %v4747_v30 }
 0x138   :  { %805 = vmatprep.subr.bf16.mxu0 %v4110_v48  ;;  %835 = vmatprep.mubr.bf16.mxu0 %v4745_v4 }
 0x13a   :  { %3287 = vmatpush3.bf16.msra.mxu1 %v3977_v34  ;;  %806 = vmatpush1.bf16.msra.mxu0 %v4119_v31 }
 0x13b   :  { %3292 = vmatprep.subr.bf16.mxu1 %v4747_v30  ;;  %909 = vmatprep.subr.bf16.mxu0 %v3912_v20 }
 0x13d   :  { %3289 = vmatmul.mubr.msk.bf16.vlgmr.msra.gmra.mrb[20].mxu1 %vm442_vm1, %v548_v44 }
 0x13e   :  { %3293 = vmatpush3.bf16.msra.mxu1 %v4130_v29  ;;  %3296 = vmatprep.mubr.msk.bf16.mxu1 %vm3816_vm2, %v4747_v30 }
 0x13f   :  { %3294 = vmatprep.subr.bf16.mxu1 %v4747_v30 }
 0x141   :  { %3089 = vmatmul.mubr.msk.bf16.vlgmr.msra.gmra.mrb[16].mxu0 %vm442_vm1, %v767_v45 }
 0x142   :  { %3295 = vmatpush3.bf16.msra.mxu1 %v4147_v49  ;;  %910 = vmatpush1.bf16.msra.mxu0 %v3926_v24 }
 0x143   :  { %3300 = vmatprep.subr.bf16.mxu1 %v4747_v30  ;;  %911 = vmatprep.subr.bf16.mxu0 %v3934_v26 }
 0x144   :  { %941 = vmatprep.mubr.bf16.mxu0 %v4745_v4 }
 0x145   :  { %3297 = vmatmul.mubr.msk.bf16.vlgmr.msra.gmra.mrb[24].mxu1 %vm442_vm1, %v548_v44 }
 0x146   :  { %3301 = vmatpush3.bf16.msra.mxu1 %v4157_v51  ;;  %3304 = vmatprep.mubr.msk.bf16.mxu1 %vm3816_vm2, %v4747_v30 }
 0x147   :  { %3302 = vmatprep.subr.bf16.mxu1 %v4747_v30  ;;  %912 = vmatpush1.bf16.msra.mxu0 %v3943_v28 }
 0x148   :  { %1011 = vmatprep.subr.bf16.mxu0 %v3997_v35 }
 0x14a   :  { %3303 = vmatpush3.bf16.msra.mxu1 %v4168_v54 }
 0x14b   :  { %3308 = vmatprep.subr.bf16.mxu1 %v4747_v30 }
 0x14d   :  { %3305 = vmatmul.mubr.msk.bf16.vlgmr.msra.gmra.mrb[28].mxu1 %vm442_vm1, %v767_v45 }
 0x14e   :  { %3309 = vmatpush3.bf16.msra.mxu1 %v3968_v33  ;;  %3312 = vmatprep.mubr.msk.bf16.mxu1 %vm3816_vm2, %v4747_v30 }
 0x14f   :  { %3310 = vmatprep.subr.bf16.mxu1 %v4747_v30 }
 0x152   :  { %3311 = vmatpush3.bf16.msra.mxu1 %v3977_v34 }
 0x153   :  { %3316 = vmatprep.subr.bf16.mxu1 %v4747_v30 }
 0x208   :  { %v586_v0 = vpop.f32.mrb[16].mxu1 }
 0x209   :  { %v633_v7 = vadd.f32 %v586_v0, %v4047_v59  ;;  %v588_v8 = vpop.f32.mrb[17].mxu1 }
 0x20a   :  { %v640_v11 = vadd.f32 %v588_v8, %v309_v62  ;;  %v590_v12 = vpop.f32.mrb[18].mxu1 }
 0x20b   :  { %v3073_v15 = vmul.f32 -1.442695, %v633_v7  ;;  %v591_v16 = vpop.f32.mrb[19].mxu1 }
 0x20c   :  { %v3074_v44 = vmul.f32 -1.442695, %v640_v11 }
 0x20d   :  { %3602 = vpow2.f32 %v3073_v15 }
 0x20e   :  { %3604 = vpow2.f32 %v3074_v44 }
 0x210   :  { %v627_v53 = vpop.f32.mrb[20].mxu1 }
 0x211   :  { %v3290_v18 = vpop.f32.mrb[21].mxu1  ;;  %v647_v44 = vadd.f32 %v627_v53, %v4093_v6 }
 0x212   :  { %v630_v60 = vpop.f32.mrb[22].mxu1  ;;  %v4199_v18 = vrot.slane %v3026_v17, %v87_v55 }
 0x213   :  { %v3291_v21 = vpop.f32.mrb[23].mxu1 }
 0x214   :  { %v837_v59 = vpop.f32.mrb[16].mxu0 }
 0x215   :  { %v3480_v45 = vadd.f32 %v837_v59, %v4194_v19  ;;  %v839_v62 = vpop.f32.mrb[17].mxu0 }
 0x216   :  { %v841_v0 = vpop.f32.mrb[18].mxu0  ;;  %v3481_v21 = vadd.f32 %v839_v62, %v4199_v18  ;;  %v4207_v62 = vld [vmem:[%s4742_s3 + $0x3] ss:$0 sm:$0xff] }
 0x217   :  { %v3603_v7 = vpop.eup %3602  ;;  %v3091_v8 = vmul.f32 -1.442695, %v3480_v45  ;;  %v842_v12 = vpop.f32.mrb[19].mxu0 }
 0x218   :  { %v637_v15 = vadd.f32 1.0, %v3603_v7  ;;  %v761_v16 = vpop.f32.mrb[24].mxu1  ;;  %v3092_v4 = vmul.f32 -1.442695, %v3481_v21  ;;  %v3605_v30 = vpop.eup %3604 }
 0x219   :  { %3606 = vpow2.f32 %v3091_v8  ;;  %v3298_v46 = vpop.f32.mrb[25].mxu1  ;;  %v644_v55 = vadd.f32 1.0, %v3605_v30 }
 0x21a   :  { %3608 = vrcp.f32 %v637_v15  ;;  %v764_v60 = vpop.f32.mrb[26].mxu1  ;;  %v4752_v46 = vsub.s32 2, %v4024_v41 }
 0x21b   :  { %v3299_v11 = vpop.f32.mrb[27].mxu1  ;;  %3610 = vpow2.f32 %v3092_v4 }
 0x21c   :  { %v4211_v60 = vrot.slane %v3026_v17, %v4752_v46 }
 0x21e   :  { %v762_v4 = vadd.f32 %v761_v16, %v4211_v60  ;;  %v4754_v16 = vmov 0  }
 0x220   :  { %v878_v59 = vpop.f32.mrb[28].mxu1 }
 0x221   :  { %v3306_v0 = vpop.f32.mrb[29].mxu1  ;;  %v898_v53 = vadd.f32 %v878_v59, %v4207_v62 }
 0x222   :  { %v881_v45 = vpop.f32.mrb[30].mxu1 }
 0x223   :  { %v3607_v12 = vpop.eup %3606  ;;  %v3307_v7 = vpop.f32.mrb[31].mxu1 }
 0x224   :  { %v3609_v8 = vpop.eup %3608  ;;  %v888_v42 = vadd.f32 1.0, %v3607_v12 }
 0x225   :  { %v648_v2 = vmul.f32 %v3609_v8, %v647_v44  ;;  %v3611_v11 = vpop.eup %3610 }
 0x226   :  { %3612 = vrcp.f32 %v888_v42 }
 0x227   :  { %v649_v15 = vadd.f32 %v648_v2, %v4042_v52  ;;  %v895_v52 = vadd.f32 1.0, %v3611_v11 }
 0x229   :  { %3614 = vtanh.f32 %v649_v15  ;;  %v315_v15 = vadd.f32 %v4070_v10, %v4059_v1 }
 0x22a   :  { %3616 = vrcp.f32 %v644_v55 }
 0x230   :  { %v3613_v21 = vpop.eup %3612 }
 0x231   :  { %v899_v30 = vmul.f32 %v3613_v21, %v898_v53 }
 0x233   :  { %v3615_v42 = vpop.eup %3614  ;;  %v900_v2 = vadd.f32 %v899_v30, %v762_v4 }
 0x234   :  { %v651_v0 = vsub.f32 %v4098_v22, %v3615_v42  ;;  %v3617_v45 = vpop.eup %3616  ;;  %v4753_v22 = vmov 0.0  }
 0x235   :  { %3618 = vtanh.f32 %v900_v2 }
 0x236   :  { %v652_v12 = vmul.f32 %v3617_v45, %v651_v0  ;;  %3620 = vrcp.f32 %v895_v52 }
 0x238   :  { %v4216_v44 = vadd.f32 %v3615_v42, %v652_v12 }
 0x23a   :  { %v905_v41 = vpack.c.bf16 %v4216_v44, %v4216_v44 }
 0x23c   :  { %3093 = vmatmul.mubr.msk.bf16.vlgmr.msra.gmra.mrb[20].mxu0 %vm442_vm1, %v905_v41  ;;  %3313 = vmatmul.mubr.msk.bf16.vlgmr.msra.gmra.mrb[32].mxu1 %vm442_vm1, %v905_v41 }
 0x23d   :  { %1012 = vmatpush1.bf16.msra.mxu0 %v4002_v36  ;;  %3317 = vmatpush3.bf16.msra.mxu1 %v4130_v29 }
 0x23e   :  { %1013 = vmatprep.subr.bf16.mxu0 %v4008_v37  ;;  %3318 = vmatprep.subr.bf16.mxu1 %v4753_v22 }
 0x23f   :  { %v3619_v17 = vpop.eup %3618  ;;  %1043 = vmatprep.mubr.bf16.mxu0 %v4754_v16  ;;  %3320 = vmatprep.mubr.msk.bf16.mxu1 %vm3816_vm2, %v4753_v22 }
 0x240   :  { %v902_v59 = vsub.f32 %v4136_v43, %v3619_v17  ;;  %v3621_v7 = vpop.eup %3620 }
 0x241   :  { %1014 = vmatpush1.bf16.msra.mxu0 %v4014_v38  ;;  %3319 = vmatpush3.bf16.msra.mxu1 %v4147_v49 }
 0x242   :  { %v903_v8 = vmul.f32 %v3621_v7, %v902_v59  ;;  %1096 = vmatprep.subr.bf16.mxu0 %v4021_v39  ;;  %3324 = vmatprep.subr.bf16.mxu1 %v4753_v22 }
 0x244   :  { %v4234_v55 = vadd.f32 %v3619_v17, %v903_v8  ;;  %3097 = vmatmul.mubr.msk.bf16.vlgmr.msra.gmra.mrb[24].mxu0 %vm442_vm1, %v905_v41  ;;  %3321 = vmatmul.mubr.msk.bf16.vlgmr.msra.gmra.mrb[36].mxu1 %vm442_vm1, %v905_v41 }
 0x245   :  { %1097 = vmatpush1.bf16.msra.mxu0 %v4103_v27  ;;  %3325 = vmatpush3.bf16.msra.mxu1 %v4157_v51 }
 0x246   :  { %3326 = vmatprep.subr.bf16.mxu1 %v4753_v22  ;;  %1098 = vmatprep.subr.bf16.mxu0 %v4110_v48  ;;  %v1092_v43 = vpack.c.bf16 %v4234_v55, %v4234_v55 }
 0x247   :  { %3328 = vmatprep.mubr.msk.bf16.mxu1 %vm3816_vm2, %v4753_v22  ;;  %1128 = vmatprep.mubr.bf16.mxu0 %v4754_v16 }
 0x249   :  { %3327 = vmatpush3.bf16.msra.mxu1 %v4168_v54  ;;  %1099 = vmatpush1.bf16.msra.mxu0 %v4119_v31 }
 0x24a   :  { %1202 = vmatprep.subr.bf16.mxu0 %v3912_v20  ;;  %3332 = vmatprep.subr.bf16.mxu1 %v4753_v22 }
 0x24c   :  { %3329 = vmatmul.mubr.msk.bf16.vlgmr.msra.gmra.mrb[40].mxu1 %vm442_vm1, %v1092_v43 }
 0x24d   :  { %3333 = vmatpush3.bf16.msra.mxu1 %v3968_v33  ;;  %3336 = vmatprep.mubr.msk.bf16.mxu1 %vm3816_vm2, %v4753_v22 }
 0x24e   :  { %3334 = vmatprep.subr.bf16.mxu1 %v4753_v22 }
 0x250   :  { %3099 = vmatmul.mubr.msk.bf16.vlgmr.msra.gmra.mrb[24].mxu0 %vm442_vm1, %v1092_v43 }
 0x251   :  { %1203 = vmatpush1.bf16.msra.mxu0 %v3926_v24  ;;  %3335 = vmatpush3.bf16.msra.mxu1 %v3977_v34 }
 0x252   :  { %1204 = vmatprep.subr.bf16.mxu0 %v3934_v26  ;;  %1234 = vmatprep.mubr.bf16.mxu0 %v4754_v16 }
 0x253   :  { %3340 = vmatprep.subr.bf16.mxu1 %v4753_v22 }
 0x255   :  { %1205 = vmatpush1.bf16.msra.mxu0 %v3943_v28 }
 0x256   :  { %1304 = vmatprep.subr.bf16.mxu0 %v3997_v35 }
 0x30f   :  { %v943_v46 = vpop.f32.mrb[20].mxu0  ;;  %v984_v53 = vpop.f32.mrb[32].mxu1 }
 0x310   :  { %v990_v11 = vadd.f32 %v943_v46, %v4068_v9  ;;  %v945_v21 = vpop.f32.mrb[21].mxu0  ;;  %v3314_v4 = vpop.f32.mrb[33].mxu1 }
 0x311   :  { %v997_v30 = vadd.f32 %v945_v21, %v315_v15  ;;  %v947_v42 = vpop.f32.mrb[22].mxu0  ;;  %v987_v52 = vpop.f32.mrb[34].mxu1 }
 0x312   :  { %v3095_v2 = vmul.f32 -1.442695, %v990_v11  ;;  %v948_v0 = vpop.f32.mrb[23].mxu0  ;;  %v3315_v45 = vpop.f32.mrb[35].mxu1 }
 0x313   :  { %v3096_v7 = vmul.f32 -1.442695, %v997_v30  ;;  %v1004_v0 = vadd.f32 %v984_v53, %v4093_v6 }
 0x314   :  { %3622 = vpow2.f32 %v3095_v2 }
 0x315   :  { %3624 = vpow2.f32 %v3096_v7 }
 0x317   :  { %v1086_v12 = vpop.f32.mrb[36].mxu1 }
 0x318   :  { %v3322_v41 = vpop.f32.mrb[37].mxu1 }
 0x319   :  { %v1089_v17 = vpop.f32.mrb[38].mxu1 }
 0x31a   :  { %v3323_v59 = vpop.f32.mrb[39].mxu1 }
 0x31e   :  { %v3623_v8 = vpop.eup %3622 }
 0x31f   :  { %v994_v10 = vadd.f32 1.0, %v3623_v8  ;;  %v1171_v43 = vpop.f32.mrb[40].mxu1  ;;  %v3625_v2 = vpop.eup %3624 }
 0x320   :  { %v3330_v3 = vpop.f32.mrb[41].mxu1  ;;  %v1001_v17 = vadd.f32 1.0, %v3625_v2 }
 0x321   :  { %3626 = vrcp.f32 %v994_v10  ;;  %v1174_v9 = vpop.f32.mrb[42].mxu1 }
 0x322   :  { %v3331_v46 = vpop.f32.mrb[43].mxu1 }
 0x323   :  { %v1130_v15 = vpop.f32.mrb[24].mxu0 }
 0x324   :  { %v3482_v21 = vadd.f32 %v1130_v15, %v4194_v19  ;;  %v1132_v11 = vpop.f32.mrb[25].mxu0 }
 0x325   :  { %v1134_v4 = vpop.f32.mrb[26].mxu0  ;;  %v3483_v41 = vadd.f32 %v1132_v11, %v4199_v18 }
 0x326   :  { %v3101_v42 = vmul.f32 -1.442695, %v3482_v21  ;;  %v1135_v52 = vpop.f32.mrb[27].mxu0  ;;  %v1191_v21 = vadd.f32 %v1171_v43, %v4207_v62 }
 0x327   :  { %v3102_v59 = vmul.f32 -1.442695, %v3483_v41 }
 0x328   :  { %3628 = vpow2.f32 %v3101_v42 }
 0x32b   :  { %v3627_v30 = vpop.eup %3626 }
 0x32c   :  { %v1005_v45 = vmul.f32 %v3627_v30, %v1004_v0 }
 0x32e   :  { %v1006_v3 = vadd.f32 %v1005_v45, %v4036_v47  ;;  %v1087_v47 = vadd.f32 %v1086_v12, %v4211_v60 }
 0x330   :  { %3630 = vtanh.f32 %v1006_v3 }
 0x331   :  { %3632 = vrcp.f32 %v1001_v17 }
 0x332   :  { %v3629_v7 = vpop.eup %3628  ;;  %3634 = vpow2.f32 %v3102_v59 }
 0x333   :  { %v1181_v8 = vadd.f32 1.0, %v3629_v7 }
 0x335   :  { %3636 = vrcp.f32 %v1181_v8 }
 0x33a   :  { %v3631_v10 = vpop.eup %3630 }
 0x33b   :  { %v1008_v9 = vsub.f32 %v4216_v44, %v3631_v10  ;;  %v3633_v46 = vpop.eup %3632 }
 0x33c   :  { %v3635_v53 = vpop.eup %3634 }
 0x33d   :  { %v1009_v15 = vmul.f32 %v3633_v46, %v1008_v9  ;;  %v1188_v0 = vadd.f32 1.0, %v3635_v53 }
 0x33f   :  { %v3637_v4 = vpop.eup %3636  ;;  %v4273_v11 = vadd.f32 %v3631_v10, %v1009_v15 }
 0x340   :  { %v1192_v42 = vmul.f32 %v3637_v4, %v1191_v21 }
 0x341   :  { %v1198_v52 = vpack.c.bf16 %v4273_v11, %v4273_v11 }
 0x342   :  { %v1193_v2 = vadd.f32 %v1192_v42, %v1087_v47 }
 0x343   :  { %3103 = vmatmul.mubr.msk.bf16.vlgmr.msra.gmra.mrb[28].mxu0 %vm442_vm1, %v1198_v52  ;;  %3337 = vmatmul.mubr.msk.bf16.vlgmr.msra.gmra.mrb[44].mxu1 %vm442_vm1, %v1198_v52 }
 0x344   :  { %3638 = vtanh.f32 %v1193_v2  ;;  %1305 = vmatpush1.bf16.msra.mxu0 %v4002_v36  ;;  %3341 = vmatpush3.bf16.msra.mxu1 %v4130_v29 }
 0x345   :  { %1306 = vmatprep.subr.bf16.mxu0 %v4008_v37  ;;  %3342 = vmatprep.subr.bf16.mxu1 %v4753_v22  ;;  %3640 = vrcp.f32 %v1188_v0 }
 0x346   :  { %1336 = vmatprep.mubr.bf16.mxu0 %v4754_v16  ;;  %3344 = vmatprep.mubr.msk.bf16.mxu1 %vm3816_vm2, %v4753_v22 }
 0x348   :  { %1307 = vmatpush1.bf16.msra.mxu0 %v4014_v38  ;;  %3343 = vmatpush3.bf16.msra.mxu1 %v4147_v49 }
 0x349   :  { %1389 = vmatprep.subr.bf16.mxu0 %v4021_v39  ;;  %3348 = vmatprep.subr.bf16.mxu1 %v4753_v22 }
 0x34b   :  { %3107 = vmatmul.mubr.msk.bf16.vlgmr.msra.gmra.mrb[32].mxu0 %vm442_vm1, %v1198_v52  ;;  %3345 = vmatmul.mubr.msk.bf16.vlgmr.msra.gmra.mrb[48].mxu1 %vm442_vm1, %v1198_v52 }
 0x34c   :  { %1390 = vmatpush1.bf16.msra.mxu0 %v4103_v27  ;;  %3349 = vmatpush3.bf16.msra.mxu1 %v4157_v51 }
 0x34d   :  { %1391 = vmatprep.subr.bf16.mxu0 %v4110_v48  ;;  %3350 = vmatprep.subr.bf16.mxu1 %v4753_v22 }
 0x34e   :  { %v3639_v44 = vpop.eup %3638  ;;  %1421 = vmatprep.mubr.bf16.mxu0 %v4754_v16  ;;  %3352 = vmatprep.mubr.msk.bf16.mxu1 %vm3816_vm2, %v4753_v22 }
 0x34f   :  { %v1195_v12 = vsub.f32 %v4234_v55, %v3639_v44  ;;  %v3641_v43 = vpop.eup %3640 }
 0x350   :  { %1392 = vmatpush1.bf16.msra.mxu0 %v4119_v31  ;;  %3351 = vmatpush3.bf16.msra.mxu1 %v4168_v54 }
 0x351   :  { %v1196_v30 = vmul.f32 %v3641_v43, %v1195_v12  ;;  %1495 = vmatprep.subr.bf16.mxu0 %v3912_v20  ;;  %3356 = vmatprep.subr.bf16.mxu1 %v4753_v22  ;;  %v319_v20 = vadd.f32 %v4074_v14, %v4059_v1 }
 0x353   :  { %v4305_v45 = vadd.f32 %v3639_v44, %v1196_v30 }
 0x355   :  { %v1385_v41 = vpack.c.bf16 %v4305_v45, %v4305_v45 }
 0x357   :  { %3109 = vmatmul.mubr.msk.bf16.vlgmr.msra.gmra.mrb[32].mxu0 %vm442_vm1, %v1385_v41  ;;  %3353 = vmatmul.mubr.msk.bf16.vlgmr.msra.gmra.mrb[52].mxu1 %vm442_vm1, %v1385_v41 }
 0x358   :  { %1496 = vmatpush1.bf16.msra.mxu0 %v3926_v24  ;;  %3357 = vmatpush3.bf16.msra.mxu1 %v3968_v33 }
 0x359   :  { %1497 = vmatprep.subr.bf16.mxu0 %v3934_v26  ;;  %3358 = vmatprep.subr.bf16.mxu1 %v4753_v22 }
 0x35a   :  { %1527 = vmatprep.mubr.bf16.mxu0 %v4754_v16  ;;  %3360 = vmatprep.mubr.msk.bf16.mxu1 %vm3816_vm2, %v4753_v22 }
 0x35c   :  { %1498 = vmatpush1.bf16.msra.mxu0 %v3943_v28  ;;  %3359 = vmatpush3.bf16.msra.mxu1 %v3977_v34 }
 0x35d   :  { %1597 = vmatprep.subr.bf16.mxu0 %v3997_v35  ;;  %3364 = vmatprep.subr.bf16.mxu1 %v4753_v22 }
 0x416   :  { %v1236_v3 = vpop.f32.mrb[28].mxu0  ;;  %v1277_v17 = vpop.f32.mrb[44].mxu1 }
 0x417   :  { %v1283_v59 = vadd.f32 %v1236_v3, %v4072_v13  ;;  %v1238_v7 = vpop.f32.mrb[29].mxu0  ;;  %v3338_v8 = vpop.f32.mrb[45].mxu1 }
 0x418   :  { %v1290_v10 = vadd.f32 %v1238_v7, %v319_v20  ;;  %v1240_v9 = vpop.f32.mrb[30].mxu0  ;;  %v1280_v46 = vpop.f32.mrb[46].mxu1 }
 0x419   :  { %v3105_v15 = vmul.f32 -1.442695, %v1283_v59  ;;  %v1241_v53 = vpop.f32.mrb[31].mxu0  ;;  %v3339_v21 = vpop.f32.mrb[47].mxu1  ;;  %v1297_v9 = vadd.f32 %v1277_v17, %v4093_v6 }
 0x41a   :  { %v3106_v2 = vmul.f32 -1.442695, %v1290_v10 }
 0x41b   :  { %3642 = vpow2.f32 %v3105_v15 }
 0x41c   :  { %3644 = vpow2.f32 %v3106_v2 }
 0x41e   :  { %v1379_v4 = vpop.f32.mrb[48].mxu1 }
 0x41f   :  { %v3346_v47 = vpop.f32.mrb[49].mxu1 }
 0x420   :  { %v1382_v42 = vpop.f32.mrb[50].mxu1 }
 0x421   :  { %v3347_v52 = vpop.f32.mrb[51].mxu1 }
 0x425   :  { %v3643_v0 = vpop.eup %3642 }
 0x426   :  { %v1287_v14 = vadd.f32 1.0, %v3643_v0  ;;  %v3645_v8 = vpop.eup %3644 }
 0x427   :  { %v1294_v21 = vadd.f32 1.0, %v3645_v8 }
 0x428   :  { %3646 = vrcp.f32 %v1287_v14 }
 0x42a   :  { %v1423_v44 = vpop.f32.mrb[32].mxu0  ;;  %v1464_v13 = vpop.f32.mrb[52].mxu1 }
 0x42b   :  { %v3484_v12 = vadd.f32 %v1423_v44, %v4194_v19  ;;  %v1425_v43 = vpop.f32.mrb[33].mxu0  ;;  %v3354_v30 = vpop.f32.mrb[53].mxu1 }
 0x42c   :  { %v1427_v41 = vpop.f32.mrb[34].mxu0  ;;  %v1467_v20 = vpop.f32.mrb[54].mxu1  ;;  %v3485_v15 = vadd.f32 %v1425_v43, %v4199_v18 }
 0x42d   :  { %v3111_v3 = vmul.f32 -1.442695, %v3484_v12  ;;  %v1428_v59 = vpop.f32.mrb[35].mxu0  ;;  %v3355_v7 = vpop.f32.mrb[55].mxu1  ;;  %v1484_v12 = vadd.f32 %v1464_v13, %v4207_v62 }
 0x42e   :  { %v3112_v47 = vmul.f32 -1.442695, %v3485_v15 }
 0x42f   :  { %3648 = vpow2.f32 %v3111_v3 }
 0x432   :  { %v3647_v10 = vpop.eup %3646 }
 0x433   :  { %v1298_v46 = vmul.f32 %v3647_v10, %v1297_v9 }
 0x435   :  { %v1299_v53 = vadd.f32 %v1298_v46, %v4039_v50  ;;  %v1380_v50 = vadd.f32 %v1379_v4, %v4211_v60 }
 0x437   :  { %3650 = vtanh.f32 %v1299_v53 }
 0x438   :  { %3652 = vrcp.f32 %v1294_v21 }
 0x439   :  { %v3649_v42 = vpop.eup %3648  ;;  %3654 = vpow2.f32 %v3112_v47 }
 0x43a   :  { %v1474_v52 = vadd.f32 1.0, %v3649_v42 }
 0x43c   :  { %3656 = vrcp.f32 %v1474_v52 }
 0x441   :  { %v3651_v2 = vpop.eup %3650 }
 0x442   :  { %v1301_v0 = vsub.f32 %v4273_v11, %v3651_v2  ;;  %v3653_v14 = vpop.eup %3652  ;;  %v4364_v11 = vld [vmem:[%s4741_s2 + $0xac] ss:$12 sps:$4 sm:$0xff]  }
 0x443   :  { %v3655_v17 = vpop.eup %3654 }
 0x444   :  { %v1302_v44 = vmul.f32 %v3653_v14, %v1301_v0  ;;  %v1481_v59 = vadd.f32 1.0, %v3655_v17 }
 0x446   :  { %v3657_v30 = vpop.eup %3656  ;;  %v4331_v43 = vadd.f32 %v3651_v2, %v1302_v44 }
 0x447   :  { %v1485_v41 = vmul.f32 %v3657_v30, %v1484_v12 }
 0x448   :  { %v1491_v20 = vpack.c.bf16 %v4331_v43, %v4331_v43 }
 0x449   :  { %v1486_v3 = vadd.f32 %v1485_v41, %v1380_v50 }
 0x44a   :  { %3113 = vmatmul.mubr.msk.bf16.vlgmr.msra.gmra.mrb[36].mxu0 %vm442_vm1, %v1491_v20  ;;  %3361 = vmatmul.mubr.msk.bf16.vlgmr.msra.gmra.mrb[56].mxu1 %vm442_vm1, %v1491_v20 }
 0x44b   :  { %3658 = vtanh.f32 %v1486_v3  ;;  %1598 = vmatpush1.bf16.msra.mxu0 %v4002_v36  ;;  %3365 = vmatpush3.bf16.msra.mxu1 %v4130_v29 }
 0x44c   :  { %1599 = vmatprep.subr.bf16.mxu0 %v4008_v37  ;;  %3366 = vmatprep.subr.bf16.mxu1 %v4753_v22  ;;  %3660 = vrcp.f32 %v1481_v59 }
 0x44d   :  { %1629 = vmatprep.mubr.bf16.mxu0 %v4754_v16  ;;  %3368 = vmatprep.mubr.msk.bf16.mxu1 %vm3816_vm2, %v4753_v22 }
 0x44f   :  { %1600 = vmatpush1.bf16.msra.mxu0 %v4014_v38  ;;  %3367 = vmatpush3.bf16.msra.mxu1 %v4147_v49 }
 0x450   :  { %1682 = vmatprep.subr.bf16.mxu0 %v4021_v39  ;;  %3372 = vmatprep.subr.bf16.mxu1 %v4753_v22 }
 0x452   :  { %3117 = vmatmul.mubr.msk.bf16.vlgmr.msra.gmra.mrb[40].mxu0 %vm442_vm1, %v1491_v20  ;;  %3369 = vmatmul.mubr.msk.bf16.vlgmr.msra.gmra.mrb[60].mxu1 %vm442_vm1, %v1491_v20 }
 0x453   :  { %1683 = vmatpush1.bf16.msra.mxu0 %v4103_v27  ;;  %3373 = vmatpush3.bf16.msra.mxu1 %v4157_v51 }
 0x454   :  { %1684 = vmatprep.subr.bf16.mxu0 %v4110_v48  ;;  %3374 = vmatprep.subr.bf16.mxu1 %v4753_v22 }
 0x455   :  { %v3659_v36 = vpop.eup %3658  ;;  %1714 = vmatprep.mubr.bf16.mxu0 %v4754_v16  ;;  %3376 = vmatprep.mubr.msk.bf16.mxu1 %vm3816_vm2, %v4753_v22 }
 0x456   :  { %v1488_v37 = vsub.f32 %v4305_v45, %v3659_v36  ;;  %v3661_v38 = vpop.eup %3660 }
 0x457   :  { %1685 = vmatpush1.bf16.msra.mxu0 %v4119_v31  ;;  %3375 = vmatpush3.bf16.msra.mxu1 %v4168_v54 }
 0x458   :  { %v1489_v39 = vmul.f32 %v3661_v38, %v1488_v37  ;;  %1788 = vmatprep.subr.bf16.mxu0 %v4364_v11  ;;  %3380 = vmatprep.subr.bf16.mxu1 %v4753_v22 }
 0x45a   :  { %v4368_v4 = vadd.f32 %v3659_v36, %v1489_v39 }
 0x45c   :  { %v1678_v13 = vpack.c.bf16 %v4368_v4, %v4368_v4 }
 0x45e   :  { %3119 = vmatmul.mubr.msk.bf16.vlgmr.msra.gmra.mrb[40].mxu0 %vm442_vm1, %v1678_v13  ;;  %3377 = vmatmul.mubr.msk.bf16.vlgmr.msra.gmra.mrb[64].mxu1 %vm442_vm1, %v1678_v13 }
 0x45f   :  { %1789 = vmatpush1.bf16.msra.mxu0 %v3926_v24  ;;  %3381 = vmatpush3.bf16.msra.mxu1 %v3968_v33  ;;  %v325_v24 = vadd.f32 %v4078_v25, %v4059_v1 }
 0x460   :  { %1790 = vmatprep.subr.bf16.mxu0 %v3934_v26  ;;  %3382 = vmatprep.subr.bf16.mxu1 %v4753_v22 }
 0x461   :  { %1820 = vmatprep.mubr.bf16.mxu0 %v4754_v16  ;;  %3384 = vmatprep.mubr.msk.bf16.mxu1 %vm3816_vm2, %v4753_v22 }
 0x463   :  { %1791 = vmatpush1.bf16.msra.mxu0 %v3943_v28  ;;  %3383 = vmatpush3.bf16.msra.mxu1 %v3977_v34 }
 0x464   :  { %1890 = vmatprep.subr.bf16.mxu0 %v3997_v35  ;;  %3388 = vmatprep.subr.bf16.mxu1 %v4753_v22 }
 0x51d   :  { %v1529_v33 = vpop.f32.mrb[36].mxu0  ;;  %v1570_v26 = vpop.f32.mrb[56].mxu1 }
 0x51e   :  { %v1576_v7 = vadd.f32 %v1529_v33, %v4076_v23  ;;  %v1531_v8 = vpop.f32.mrb[37].mxu0  ;;  %v3362_v9 = vpop.f32.mrb[57].mxu1  ;;  %v1590_v59 = vadd.f32 %v1570_v26, %v4093_v6 }
 0x51f   :  { %v1583_v10 = vadd.f32 %v1531_v8, %v325_v24  ;;  %v1533_v46 = vpop.f32.mrb[38].mxu0  ;;  %v1573_v15 = vpop.f32.mrb[58].mxu1 }
 0x520   :  { %v3115_v53 = vmul.f32 -1.442695, %v1576_v7  ;;  %v1534_v28 = vpop.f32.mrb[39].mxu0  ;;  %v3363_v21 = vpop.f32.mrb[59].mxu1 }
 0x521   :  { %v3116_v52 = vmul.f32 -1.442695, %v1583_v10 }
 0x522   :  { %3662 = vpow2.f32 %v3115_v53 }
 0x523   :  { %3664 = vpow2.f32 %v3116_v52 }
 0x525   :  { %v1672_v34 = vpop.f32.mrb[60].mxu1 }
 0x526   :  { %v3370_v35 = vpop.f32.mrb[61].mxu1 }
 0x527   :  { %v1675_v47 = vpop.f32.mrb[62].mxu1 }
 0x528   :  { %v3371_v42 = vpop.f32.mrb[63].mxu1 }
 0x529   :  { %v4421_v42 = vld [vmem:[%s4741_s2 + $0xf0] ss:$12 sps:$4 sm:$0xff]  }
 0x52c   :  { %v3663_v2 = vpop.eup %3662 }
 0x52d   :  { %v1580_v25 = vadd.f32 1.0, %v3663_v2  ;;  %v3665_v3 = vpop.eup %3664 }
 0x52e   :  { %v1587_v13 = vadd.f32 1.0, %v3665_v3 }
 0x52f   :  { %3666 = vrcp.f32 %v1580_v25  ;;  %v4467_v25 = vld [vmem:[%s4741_s2 + $0xc4] ss:$12 sps:$4 sm:$0xff]  }
 0x531   :  { %v1716_v0 = vpop.f32.mrb[40].mxu0  ;;  %v1757_v23 = vpop.f32.mrb[64].mxu1 }
 0x532   :  { %v3486_v14 = vadd.f32 %v1716_v0, %v4194_v19  ;;  %v1718_v44 = vpop.f32.mrb[41].mxu0  ;;  %v3378_v17 = vpop.f32.mrb[65].mxu1  ;;  %v1777_v26 = vadd.f32 %v1757_v23, %v4207_v62  ;;  %v4477_v0 = vld [vmem:[%s4741_s2 + $0xc0] ss:$12 sps:$4 sm:$0xff]   ;;  %v4483_v23 = vld [vmem:[%s4741_s2 + $0xc8] ss:$12 sps:$4 sm:$0xff]  }
 0x533   :  { %v1720_v12 = vpop.f32.mrb[42].mxu0  ;;  %v1760_v30 = vpop.f32.mrb[66].mxu1  ;;  %v3487_v38 = vadd.f32 %v1718_v44, %v4199_v18  ;;  %v329_v44 = vadd.f32 %v4082_v40, %v4059_v1 }
 0x534   :  { %v3121_v50 = vmul.f32 -1.442695, %v3486_v14  ;;  %v1721_v41 = vpop.f32.mrb[43].mxu0  ;;  %v3379_v20 = vpop.f32.mrb[67].mxu1  ;;  %v4489_v14 = vld [vmem:[%s4741_s2 + $0xdc] ss:$12 sps:$4 sm:$0xff]  }
 0x535   :  { %v3122_v24 = vmul.f32 -1.442695, %v3487_v38 }
 0x536   :  { %3668 = vpow2.f32 %v3121_v50 }
 0x539   :  { %v3667_v36 = vpop.eup %3666 }
 0x53a   :  { %v1591_v37 = vmul.f32 %v3667_v36, %v1590_v59 }
 0x53c   :  { %v1592_v39 = vadd.f32 %v1591_v37, %v4055_v63  ;;  %v1673_v63 = vadd.f32 %v1672_v34, %v4211_v60  ;;  %v4411_v34 = vld [vmem:[%s4741_s2 + $0xf4] ss:$12 sps:$4 sm:$0xff]  }
 0x53e   :  { %3670 = vtanh.f32 %v1592_v39 }
 0x53f   :  { %3672 = vrcp.f32 %v1587_v13 }
 0x540   :  { %v3669_v33 = vpop.eup %3668  ;;  %3674 = vpow2.f32 %v3122_v24 }
 0x541   :  { %v1767_v7 = vadd.f32 1.0, %v3669_v33 }
 0x543   :  { %3676 = vrcp.f32 %v1767_v7 }
 0x548   :  { %v3671_v8 = vpop.eup %3670 }
 0x549   :  { %v1594_v9 = vsub.f32 %v4331_v43, %v3671_v8  ;;  %v3673_v10 = vpop.eup %3672  ;;  %v4404_v43 = vld [vmem:[%s4741_s2 + $0xd8] ss:$12 sps:$4 sm:$0xff]  }
 0x54a   :  { %v3675_v6 = vpop.eup %3674 }
 0x54b   :  { %v1595_v46 = vmul.f32 %v3673_v10, %v1594_v9  ;;  %v1774_v47 = vadd.f32 1.0, %v3675_v6 }
 0x54d   :  { %v3677_v15 = vpop.eup %3676  ;;  %v4394_v53 = vadd.f32 %v3671_v8, %v1595_v46 }
 0x54e   :  { %v1778_v28 = vmul.f32 %v3677_v15, %v1777_v26 }
 0x54f   :  { %v1784_v21 = vpack.c.bf16 %v4394_v53, %v4394_v53 }
 0x550   :  { %v1779_v35 = vadd.f32 %v1778_v28, %v1673_v63 }
 0x551   :  { %3123 = vmatmul.mubr.msk.bf16.vlgmr.msra.gmra.mrb[44].mxu0 %vm442_vm1, %v1784_v21  ;;  %3385 = vmatmul.mubr.msk.bf16.vlgmr.msra.gmra.mrb[68].mxu1 %vm442_vm1, %v1784_v21 }
 0x552   :  { %3678 = vtanh.f32 %v1779_v35  ;;  %1891 = vmatpush1.bf16.msra.mxu0 %v4404_v43  ;;  %3389 = vmatpush3.bf16.msra.mxu1 %v4130_v29  ;;  %v4428_v29 = vld [vmem:[%s4741_s2 + $0x10c] ss:$12 sps:$4 sm:$0xff]  }
 0x553   :  { %1892 = vmatprep.subr.bf16.mxu0 %v4411_v34  ;;  %3390 = vmatprep.subr.bf16.mxu1 %v4753_v22  ;;  %3680 = vrcp.f32 %v1774_v47  ;;  %v4500_v47 = vld [vmem:[%s4742_s3 + $0x2] ss:$0 sm:$0xff] }
 0x554   :  { %1922 = vmatprep.mubr.bf16.mxu0 %v4754_v16  ;;  %3392 = vmatprep.mubr.msk.bf16.mxu1 %vm3816_vm2, %v4753_v22 }
 0x556   :  { %1893 = vmatpush1.bf16.msra.mxu0 %v4421_v42  ;;  %3391 = vmatpush3.bf16.msra.mxu1 %v4147_v49 }
 0x557   :  { %1975 = vmatprep.subr.bf16.mxu0 %v4428_v29  ;;  %3396 = vmatprep.subr.bf16.mxu1 %v4753_v22 }
 0x559   :  { %3127 = vmatmul.mubr.msk.bf16.vlgmr.msra.gmra.mrb[48].mxu0 %vm442_vm1, %v1784_v21  ;;  %3393 = vmatmul.mubr.msk.bf16.vlgmr.msra.gmra.mrb[72].mxu1 %vm442_vm1, %v1784_v21 }
 0x55a   :  { %1976 = vmatpush1.bf16.msra.mxu0 %v4103_v27  ;;  %3397 = vmatpush3.bf16.msra.mxu1 %v4157_v51 }
 0x55b   :  { %1977 = vmatprep.subr.bf16.mxu0 %v4110_v48  ;;  %3398 = vmatprep.subr.bf16.mxu1 %v4753_v22 }
 0x55c   :  { %v3679_v49 = vpop.eup %3678  ;;  %2007 = vmatprep.mubr.bf16.mxu0 %v4754_v16  ;;  %3400 = vmatprep.mubr.msk.bf16.mxu1 %vm3816_vm2, %v4753_v22 }
 0x55d   :  { %v1781_v52 = vsub.f32 %v4368_v4, %v3679_v49  ;;  %v3681_v2 = vpop.eup %3680 }
 0x55e   :  { %1978 = vmatpush1.bf16.msra.mxu0 %v4119_v31  ;;  %3399 = vmatpush3.bf16.msra.mxu1 %v4168_v54  ;;  %v4455_v31 = vld [vmem:[%s4741_s2 + $0xa8] ss:$12 sps:$4 sm:$0xff]   ;;  %v4461_v54 = vld [vmem:[%s4741_s2 + $0xb0] ss:$12 sps:$4 sm:$0xff]  }
 0x55f   :  { %v1782_v27 = vmul.f32 %v3681_v2, %v1781_v52  ;;  %2081 = vmatprep.subr.bf16.mxu0 %v4364_v11  ;;  %3404 = vmatprep.subr.bf16.mxu1 %v4753_v22 }
 0x561   :  { %v4446_v48 = vadd.f32 %v3679_v49, %v1782_v27 }
 0x563   :  { %v1971_v51 = vpack.c.bf16 %v4446_v48, %v4446_v48 }
 0x565   :  { %3129 = vmatmul.mubr.msk.bf16.vlgmr.msra.gmra.mrb[48].mxu0 %vm442_vm1, %v1971_v51  ;;  %3401 = vmatmul.mubr.msk.bf16.vlgmr.msra.gmra.mrb[76].mxu1 %vm442_vm1, %v1971_v51 }
 0x566   :  { %2082 = vmatpush1.bf16.msra.mxu0 %v4455_v31  ;;  %3405 = vmatpush3.bf16.msra.mxu1 %v4461_v54 }
 0x567   :  { %2083 = vmatprep.subr.bf16.mxu0 %v4467_v25  ;;  %3406 = vmatprep.subr.bf16.mxu1 %v4753_v22 }
 0x568   :  { %2113 = vmatprep.mubr.bf16.mxu0 %v4754_v16  ;;  %3408 = vmatprep.mubr.msk.bf16.mxu1 %vm3816_vm2, %v4753_v22 }
 0x56a   :  { %2084 = vmatpush1.bf16.msra.mxu0 %v4477_v0  ;;  %3407 = vmatpush3.bf16.msra.mxu1 %v4483_v23 }
 0x56b   :  { %2183 = vmatprep.subr.bf16.mxu0 %v4489_v14  ;;  %3412 = vmatprep.subr.bf16.mxu1 %v4753_v22 }
 0x624   :  { %v1822_v17 = vpop.f32.mrb[44].mxu0  ;;  %v1863_v12 = vpop.f32.mrb[68].mxu1 }
 0x625   :  { %v1869_v30 = vadd.f32 %v1822_v17, %v4080_v32  ;;  %v1824_v50 = vpop.f32.mrb[45].mxu0  ;;  %v3386_v41 = vpop.f32.mrb[69].mxu1  ;;  %v1883_v49 = vadd.f32 %v4500_v47, %v1863_v12 }
 0x626   :  { %v1876_v20 = vadd.f32 %v1824_v50, %v329_v44  ;;  %v1826_v3 = vpop.f32.mrb[46].mxu0  ;;  %v1866_v59 = vpop.f32.mrb[70].mxu1 }
 0x627   :  { %v3125_v36 = vmul.f32 -1.442695, %v1869_v30  ;;  %v1827_v37 = vpop.f32.mrb[47].mxu0  ;;  %v3387_v38 = vpop.f32.mrb[71].mxu1 }
 0x628   :  { %v3126_v7 = vmul.f32 -1.442695, %v1876_v20 }
 0x629   :  { %3682 = vpow2.f32 %v3125_v36 }
 0x62a   :  { %3684 = vpow2.f32 %v3126_v7 }
 0x62c   :  { %v1965_v39 = vpop.f32.mrb[72].mxu1 }
 0x62d   :  { %v3394_v13 = vpop.f32.mrb[73].mxu1 }
 0x62e   :  { %v1968_v24 = vpop.f32.mrb[74].mxu1 }
 0x62f   :  { %v3395_v33 = vpop.f32.mrb[75].mxu1 }
 0x633   :  { %v3683_v8 = vpop.eup %3682 }
 0x634   :  { %v1873_v40 = vadd.f32 1.0, %v3683_v8  ;;  %v3685_v35 = vpop.eup %3684  ;;  %v4546_v8 = vld [vmem:[%s4741_s2 + $0x110] ss:$12 sps:$4 sm:$0xff]  }
 0x635   :  { %v1880_v44 = vadd.f32 1.0, %v3685_v35 }
 0x636   :  { %3686 = vrcp.f32 %v1873_v40  ;;  %v4552_v40 = vld [vmem:[%s4741_s2 + $0x124] ss:$12 sps:$4 sm:$0xff]  }
 0x638   :  { %v2009_v9 = vpop.f32.mrb[48].mxu0  ;;  %v2050_v32 = vpop.f32.mrb[76].mxu1 }
 0x639   :  { %v3488_v10 = vadd.f32 %v2009_v9, %v4194_v19  ;;  %v2011_v46 = vpop.f32.mrb[49].mxu0  ;;  %v3402_v6 = vpop.f32.mrb[77].mxu1  ;;  %v2070_v36 = vadd.f32 %v2050_v32, %v4207_v62  ;;  %v4518_v62 = vld [vmem:[%s4741_s2 + $0xe0] ss:$12 sps:$4 sm:$0xff]  }
 0x63a   :  { %v2013_v26 = vpop.f32.mrb[50].mxu0  ;;  %v2053_v15 = vpop.f32.mrb[78].mxu1  ;;  %v3489_v27 = vadd.f32 %v2011_v46, %v4199_v18  ;;  %v4563_v46 = vld [vmem:[%s4741_s2 + $0x120] ss:$12 sps:$4 sm:$0xff]   ;;  %v4569_v6 = vld [vmem:[%s4741_s2 + $0x128] ss:$12 sps:$4 sm:$0xff]  }
 0x63b   :  { %v3131_v63 = vmul.f32 -1.442695, %v3488_v10  ;;  %v2014_v28 = vpop.f32.mrb[51].mxu0  ;;  %v3403_v21 = vpop.f32.mrb[79].mxu1 }
 0x63c   :  { %v3132_v17 = vmul.f32 -1.442695, %v3489_v27 }
 0x63d   :  { %3688 = vpow2.f32 %v3131_v63 }
 0x640   :  { %v3687_v52 = vpop.eup %3686 }
 0x641   :  { %v1884_v2 = vmul.f32 %v3687_v52, %v1883_v49 }
 0x643   :  { %v1885_v51 = vadd.f32 %v1884_v2, %v4065_v5  ;;  %v1966_v5 = vadd.f32 %v1965_v39, %v4211_v60  ;;  %v4540_v39 = vld [vmem:[%s4741_s2 + $0x108] ss:$12 sps:$4 sm:$0xff]  }
 0x645   :  { %3690 = vtanh.f32 %v1885_v51 }
 0x646   :  { %3692 = vrcp.f32 %v1880_v44 }
 0x647   :  { %v3689_v30 = vpop.eup %3688  ;;  %3694 = vpow2.f32 %v3132_v17 }
 0x648   :  { %v2060_v50 = vadd.f32 1.0, %v3689_v30 }
 0x64a   :  { %3696 = vrcp.f32 %v2060_v50 }
 0x64f   :  { %v3691_v41 = vpop.eup %3690 }
 0x650   :  { %v1887_v20 = vsub.f32 %v4394_v53, %v3691_v41  ;;  %v3693_v3 = vpop.eup %3692  ;;  %v4530_v53 = vld [vmem:[%s4741_s2 + $0xf8] ss:$12 sps:$4 sm:$0xff]  }
 0x651   :  { %v3695_v12 = vpop.eup %3694 }
 0x652   :  { %v1888_v59 = vmul.f32 %v3693_v3, %v1887_v20  ;;  %v2067_v7 = vadd.f32 1.0, %v3695_v12 }
 0x654   :  { %v3697_v37 = vpop.eup %3696  ;;  %v4507_v38 = vadd.f32 %v3691_v41, %v1888_v59 }
 0x655   :  { %v2071_v13 = vmul.f32 %v3697_v37, %v2070_v36 }
 0x656   :  { %v2077_v24 = vpack.c.bf16 %v4507_v38, %v4507_v38 }
 0x657   :  { %v2072_v33 = vadd.f32 %v2071_v13, %v1966_v5 }
 0x658   :  { %3133 = vmatmul.mubr.msk.bf16.vlgmr.msra.gmra.mrb[52].mxu0 %vm442_vm1, %v2077_v24  ;;  %3409 = vmatmul.mubr.msk.bf16.vlgmr.msra.gmra.mrb[80].mxu1 %vm442_vm1, %v2077_v24 }
 0x659   :  { %3698 = vtanh.f32 %v2072_v33  ;;  %2184 = vmatpush1.bf16.msra.mxu0 %v4404_v43  ;;  %3413 = vmatpush3.bf16.msra.mxu1 %v4518_v62 }
 0x65a   :  { %2185 = vmatprep.subr.bf16.mxu0 %v4411_v34  ;;  %3414 = vmatprep.subr.bf16.mxu1 %v4753_v22  ;;  %3700 = vrcp.f32 %v2067_v7 }
 0x65b   :  { %2215 = vmatprep.mubr.bf16.mxu0 %v4754_v16  ;;  %3416 = vmatprep.mubr.msk.bf16.mxu1 %vm3816_vm2, %v4753_v22 }
 0x65d   :  { %2186 = vmatpush1.bf16.msra.mxu0 %v4421_v42  ;;  %3415 = vmatpush3.bf16.msra.mxu1 %v4530_v53 }
 0x65e   :  { %2268 = vmatprep.subr.bf16.mxu0 %v4428_v29  ;;  %3420 = vmatprep.subr.bf16.mxu1 %v4753_v22 }
 0x660   :  { %3137 = vmatmul.mubr.msk.bf16.vlgmr.msra.gmra.mrb[56].mxu0 %vm442_vm1, %v2077_v24  ;;  %3417 = vmatmul.mubr.msk.bf16.vlgmr.msra.gmra.mrb[84].mxu1 %vm442_vm1, %v2077_v24 }
 0x661   :  { %2269 = vmatpush1.bf16.msra.mxu0 %v4540_v39  ;;  %3421 = vmatpush3.bf16.msra.mxu1 %v4546_v8 }
 0x662   :  { %2270 = vmatprep.subr.bf16.mxu0 %v4552_v40  ;;  %3422 = vmatprep.subr.bf16.mxu1 %v4753_v22 }
 0x663   :  { %v3699_v9 = vpop.eup %3698  ;;  %2300 = vmatprep.mubr.bf16.mxu0 %v4754_v16  ;;  %3424 = vmatprep.mubr.msk.bf16.mxu1 %vm3816_vm2, %v4753_v22 }
 0x664   :  { %v2074_v32 = vsub.f32 %v4446_v48, %v3699_v9  ;;  %v3701_v10 = vpop.eup %3700 }
 0x665   :  { %2271 = vmatpush1.bf16.msra.mxu0 %v4563_v46  ;;  %3423 = vmatpush3.bf16.msra.mxu1 %v4569_v6 }
 0x666   :  { %v2075_v26 = vmul.f32 %v3701_v10, %v2074_v32  ;;  %2374 = vmatprep.subr.bf16.mxu0 %v4364_v11  ;;  %3428 = vmatprep.subr.bf16.mxu1 %v4753_v22  ;;  %v335_v11 = vadd.f32 %v4086_v57, %v4059_v1 }
 0x668   :  { %v4574_v15 = vadd.f32 %v3699_v9, %v2075_v26 }
 0x66a   :  { %v2264_v63 = vpack.c.bf16 %v4574_v15, %v4574_v15 }
 0x66c   :  { %3139 = vmatmul.mubr.msk.bf16.vlgmr.msra.gmra.mrb[56].mxu0 %vm442_vm1, %v2264_v63  ;;  %3425 = vmatmul.mubr.msk.bf16.vlgmr.msra.gmra.mrb[88].mxu1 %vm442_vm1, %v2264_v63 }
 0x66d   :  { %2375 = vmatpush1.bf16.msra.mxu0 %v4455_v31  ;;  %3429 = vmatpush3.bf16.msra.mxu1 %v4461_v54 }
 0x66e   :  { %2376 = vmatprep.subr.bf16.mxu0 %v4467_v25  ;;  %3430 = vmatprep.subr.bf16.mxu1 %v4753_v22 }
 0x66f   :  { %2406 = vmatprep.mubr.bf16.mxu0 %v4754_v16  ;;  %3432 = vmatprep.mubr.msk.bf16.mxu1 %vm3816_vm2, %v4753_v22 }
 0x671   :  { %2377 = vmatpush1.bf16.msra.mxu0 %v4477_v0  ;;  %3431 = vmatpush3.bf16.msra.mxu1 %v4483_v23 }
 0x672   :  { %2476 = vmatprep.subr.bf16.mxu0 %v4489_v14  ;;  %3436 = vmatprep.subr.bf16.mxu1 %v4753_v22 }
 0x72b   :  { %v2115_v31 = vpop.f32.mrb[52].mxu0  ;;  %v2156_v54 = vpop.f32.mrb[80].mxu1 }
 0x72c   :  { %v2162_v25 = vadd.f32 %v2115_v31, %v4084_v56  ;;  %v2117_v28 = vpop.f32.mrb[53].mxu0  ;;  %v3410_v21 = vpop.f32.mrb[81].mxu1  ;;  %v2176_v33 = vadd.f32 %v4500_v47, %v2156_v54 }
 0x72d   :  { %v2169_v35 = vadd.f32 %v2117_v28, %v335_v11  ;;  %v2119_v49 = vpop.f32.mrb[54].mxu0  ;;  %v2159_v52 = vpop.f32.mrb[82].mxu1 }
 0x72e   :  { %v3135_v2 = vmul.f32 -1.442695, %v2162_v25  ;;  %v2120_v0 = vpop.f32.mrb[55].mxu0  ;;  %v3411_v27 = vpop.f32.mrb[83].mxu1  ;;  %v4602_v49 = vld [vmem:[%s4742_s3 + $0x3] ss:$0 sm:$0xff] }
 0x72f   :  { %v3136_v30 = vmul.f32 -1.442695, %v2169_v35 }
 0x730   :  { %3702 = vpow2.f32 %v3135_v2 }
 0x731   :  { %3704 = vpow2.f32 %v3136_v30 }
 0x733   :  { %v2258_v23 = vpop.f32.mrb[84].mxu1 }
 0x734   :  { %v3418_v51 = vpop.f32.mrb[85].mxu1  ;;  %v2259_v0 = vadd.f32 %v2258_v23, %v4211_v60 }
 0x735   :  { %v2261_v44 = vpop.f32.mrb[86].mxu1 }
 0x736   :  { %v3419_v17 = vpop.f32.mrb[87].mxu1 }
 0x73a   :  { %v3703_v50 = vpop.eup %3702 }
 0x73b   :  { %v2166_v57 = vadd.f32 1.0, %v3703_v50  ;;  %v3705_v24 = vpop.eup %3704 }
 0x73c   :  { %v2173_v26 = vadd.f32 1.0, %v3705_v24 }
 0x73d   :  { %3706 = vrcp.f32 %v2166_v57 }
 0x73f   :  { %v2302_v41 = vpop.f32.mrb[56].mxu0  ;;  %v2343_v56 = vpop.f32.mrb[88].mxu1 }
 0x740   :  { %v3490_v20 = vadd.f32 %v2302_v41, %v4194_v19  ;;  %v2304_v3 = vpop.f32.mrb[57].mxu0  ;;  %v3426_v59 = vpop.f32.mrb[89].mxu1 }
 0x741   :  { %v2306_v12 = vpop.f32.mrb[58].mxu0  ;;  %v2346_v36 = vpop.f32.mrb[90].mxu1  ;;  %v3491_v32 = vadd.f32 %v2304_v3, %v4199_v18 }
 0x742   :  { %v3141_v37 = vmul.f32 -1.442695, %v3490_v20  ;;  %v2307_v5 = vpop.f32.mrb[59].mxu0  ;;  %v3427_v13 = vpop.f32.mrb[91].mxu1 }
 0x743   :  { %v3142_v63 = vmul.f32 -1.442695, %v3491_v32 }
 0x744   :  { %3708 = vpow2.f32 %v3141_v37 }
 0x747   :  { %v3707_v7 = vpop.eup %3706 }
 0x748   :  { %v2177_v9 = vmul.f32 %v3707_v7, %v2176_v33 }
 0x74a   :  { %v2178_v10 = vadd.f32 %v2177_v9, %v4052_v61  ;;  %v2363_v61 = vadd.f32 %v4602_v49, %v2343_v56 }
 0x74c   :  { %3710 = vtanh.f32 %v2178_v10 }
 0x74d   :  { %3712 = vrcp.f32 %v2173_v26 }
 0x74e   :  { %v3709_v11 = vpop.eup %3708  ;;  %3714 = vpow2.f32 %v3142_v63 }
 0x74f   :  { %v2353_v31 = vadd.f32 1.0, %v3709_v11 }
 0x751   :  { %3716 = vrcp.f32 %v2353_v31 }
 0x756   :  { %v3711_v25 = vpop.eup %3710 }
 0x757   :  { %v2180_v28 = vsub.f32 %v4507_v38, %v3711_v25  ;;  %v3713_v21 = vpop.eup %3712 }
 0x758   :  { %v3715_v54 = vpop.eup %3714 }
 0x759   :  { %v2181_v35 = vmul.f32 %v3713_v21, %v2180_v28  ;;  %v2360_v44 = vadd.f32 1.0, %v3715_v54 }
 0x75b   :  { %v3717_v52 = vpop.eup %3716  ;;  %v4605_v2 = vadd.f32 %v3711_v25, %v2181_v35 }
 0x75c   :  { %v2364_v27 = vmul.f32 %v3717_v52, %v2363_v61 }
 0x75d   :  { %v2370_v51 = vpack.c.bf16 %v4605_v2, %v4605_v2 }
 0x75e   :  { %v2365_v38 = vadd.f32 %v2364_v27, %v2259_v0  ;;  %v4756_v0 = vld [vmem:[#allocation5_spill] sm:$0xff] }
 0x75f   :  { %3143 = vmatmul.mubr.msk.bf16.vlgmr.msra.gmra.mrb[60].mxu0 %vm442_vm1, %v2370_v51  ;;  %3433 = vmatmul.mubr.msk.bf16.vlgmr.msra.gmra.mrb[92].mxu1 %vm442_vm1, %v2370_v51 }
 0x760   :  { %3718 = vtanh.f32 %v2365_v38  ;;  %2477 = vmatpush1.bf16.msra.mxu0 %v4404_v43  ;;  %3437 = vmatpush3.bf16.msra.mxu1 %v4518_v62 }
 0x761   :  { %2478 = vmatprep.subr.bf16.mxu0 %v4411_v34  ;;  %3438 = vmatprep.subr.bf16.mxu1 %v4753_v22  ;;  %3720 = vrcp.f32 %v2360_v44 }
 0x762   :  { %2508 = vmatprep.mubr.bf16.mxu0 %v4754_v16  ;;  %3440 = vmatprep.mubr.msk.bf16.mxu1 %vm3816_vm2, %v4753_v22 }
 0x764   :  { %2479 = vmatpush1.bf16.msra.mxu0 %v4421_v42  ;;  %3439 = vmatpush3.bf16.msra.mxu1 %v4530_v53 }
 0x765   :  { %2561 = vmatprep.subr.bf16.mxu0 %v4428_v29  ;;  %3444 = vmatprep.subr.bf16.mxu1 %v4753_v22 }
 0x767   :  { %3147 = vmatmul.mubr.msk.bf16.vlgmr.msra.gmra.mrb[64].mxu0 %vm442_vm1, %v2370_v51  ;;  %3441 = vmatmul.mubr.msk.bf16.vlgmr.msra.gmra.mrb[96].mxu1 %vm442_vm1, %v2370_v51 }
 0x768   :  { %2562 = vmatpush1.bf16.msra.mxu0 %v4540_v39  ;;  %3445 = vmatpush3.bf16.msra.mxu1 %v4546_v8 }
 0x769   :  { %2563 = vmatprep.subr.bf16.mxu0 %v4552_v40  ;;  %3446 = vmatprep.subr.bf16.mxu1 %v4753_v22 }
 0x76a   :  { %v3719_v23 = vpop.eup %3718  ;;  %2593 = vmatprep.mubr.bf16.mxu0 %v4754_v16  ;;  %3448 = vmatprep.mubr.msk.bf16.mxu1 %vm3816_vm2, %v4753_v22 }
 0x76b   :  { %v2367_v17 = vsub.f32 %v4574_v15, %v3719_v23  ;;  %v3721_v30 = vpop.eup %3720 }
 0x76c   :  { %2564 = vmatpush1.bf16.msra.mxu0 %v4563_v46  ;;  %3447 = vmatpush3.bf16.msra.mxu1 %v4569_v6 }
 0x76d   :  { %v2368_v50 = vmul.f32 %v3721_v30, %v2367_v17  ;;  %2667 = vmatprep.subr.bf16.mxu0 %v4489_v14  ;;  %3452 = vmatprep.subr.bf16.mxu1 %v4753_v22 }
 0x76f   :  { %v4637_v57 = vadd.f32 %v3719_v23, %v2368_v50 }
 0x771   :  { %v2557_v41 = vpack.c.bf16 %v4637_v57, %v4637_v57 }
 0x773   :  { %3149 = vmatmul.mubr.msk.bf16.vlgmr.msra.gmra.mrb[64].mxu0 %vm442_vm1, %v2557_v41  ;;  %3449 = vmatmul.mubr.msk.bf16.vlgmr.msra.gmra.mrb[100].mxu1 %vm442_vm1, %v2557_v41 }
 0x774   :  { %2668 = vmatpush1.bf16.msra.mxu0 %v4404_v43  ;;  %3453 = vmatpush3.bf16.msra.mxu1 %v4518_v62  ;;  %v339_v43 = vadd.f32 %v4184_v58, %v4059_v1  ;;  %v4755_v62 = vld [vmem:[#allocation6_spill] sm:$0xff] }
 0x775   :  { %2669 = vmatprep.subr.bf16.mxu0 %v4411_v34  ;;  %3454 = vmatprep.subr.bf16.mxu1 %v4753_v22 }
 0x776   :  { %2699 = vmatprep.mubr.bf16.mxu0 %v4754_v16  ;;  %3456 = vmatprep.mubr.msk.bf16.mxu1 %vm3816_vm2, %v4753_v22 }
 0x778   :  { %2670 = vmatpush1.bf16.msra.mxu0 %v4421_v42  ;;  %3455 = vmatpush3.bf16.msra.mxu1 %v4530_v53 }
 0x779   :  { %2752 = vmatprep.subr.bf16.mxu0 %v4428_v29  ;;  %3460 = vmatprep.subr.bf16.mxu1 %v4753_v22 }
 0x832   :  { %v2408_v14 = vpop.f32.mrb[60].mxu0  ;;  %v2449_v34 = vpop.f32.mrb[92].mxu1 }
 0x833   :  { %v2455_v56 = vadd.f32 %v2408_v14, %v4755_v62  ;;  %v2410_v20 = vpop.f32.mrb[61].mxu0  ;;  %v3434_v3 = vpop.f32.mrb[93].mxu1  ;;  %v2469_v35 = vadd.f32 %v4500_v47, %v2449_v34 }
 0x834   :  { %v2462_v59 = vadd.f32 %v2410_v20, %v339_v43  ;;  %v2412_v12 = vpop.f32.mrb[62].mxu0  ;;  %v2452_v36 = vpop.f32.mrb[94].mxu1 }
 0x835   :  { %v3145_v37 = vmul.f32 -1.442695, %v2455_v56  ;;  %v2413_v42 = vpop.f32.mrb[63].mxu0  ;;  %v3435_v5 = vpop.f32.mrb[95].mxu1 }
 0x836   :  { %v3146_v33 = vmul.f32 -1.442695, %v2462_v59  ;;  %v3591_v42 = vld [vmem:[%s4741_s2 + $0x150] ss:$12 sps:$4 sm:$0xff]  }
 0x837   :  { %3722 = vpow2.f32 %v3145_v37 }
 0x838   :  { %3724 = vpow2.f32 %v3146_v33 }
 0x83a   :  { %v2551_v53 = vpop.f32.mrb[96].mxu1 }
 0x83b   :  { %v3442_v29 = vpop.f32.mrb[97].mxu1  ;;  %v2552_v62 = vadd.f32 %v2551_v53, %v4211_v60 }
 0x83c   :  { %v2554_v13 = vpop.f32.mrb[98].mxu1 }
 0x83d   :  { %v3443_v24 = vpop.f32.mrb[99].mxu1 }
 0x841   :  { %v3723_v7 = vpop.eup %3722 }
 0x842   :  { %v2459_v1 = vadd.f32 1.0, %v3723_v7  ;;  %v3725_v21 = vpop.eup %3724 }
 0x843   :  { %v2466_v51 = vadd.f32 1.0, %v3725_v21 }
 0x844   :  { %3726 = vrcp.f32 %v2459_v1 }
 0x846   :  { %v2595_v58 = vpop.f32.mrb[64].mxu0  ;;  %v2636_v9 = vpop.f32.mrb[100].mxu1 }
 0x847   :  { %v3492_v32 = vadd.f32 %v2595_v58, %v4194_v19  ;;  %v2597_v10 = vpop.f32.mrb[65].mxu0  ;;  %v3450_v26 = vpop.f32.mrb[101].mxu1  ;;  %v2656_v43 = vadd.f32 %v4602_v49, %v2636_v9 }
 0x848   :  { %v2599_v63 = vpop.f32.mrb[66].mxu0  ;;  %v2639_v11 = vpop.f32.mrb[102].mxu1  ;;  %v3493_v52 = vadd.f32 %v2597_v10, %v4199_v18 }
 0x849   :  { %v3151_v31 = vmul.f32 -1.442695, %v3492_v32  ;;  %v2600_v25 = vpop.f32.mrb[67].mxu0  ;;  %v3451_v28 = vpop.f32.mrb[103].mxu1 }
 0x84a   :  { %v3152_v38 = vmul.f32 -1.442695, %v3493_v52 }
 0x84b   :  { %3728 = vpow2.f32 %v3151_v31 }
 0x84e   :  { %v3727_v54 = vpop.eup %3726 }
 0x84f   :  { %v2470_v61 = vmul.f32 %v3727_v54, %v2469_v35 }
 0x851   :  { %v2471_v27 = vadd.f32 %v2470_v61, %v4756_v0 }
 0x853   :  { %3730 = vtanh.f32 %v2471_v27 }
 0x854   :  { %3732 = vrcp.f32 %v2466_v51 }
 0x855   :  { %v3729_v44 = vpop.eup %3728  ;;  %3734 = vpow2.f32 %v3152_v38 }
 0x856   :  { %v2646_v23 = vadd.f32 1.0, %v3729_v44 }
 0x858   :  { %3736 = vrcp.f32 %v2646_v23 }
 0x85d   :  { %v3731_v17 = vpop.eup %3730 }
 0x85e   :  { %v2473_v30 = vsub.f32 %v4605_v2, %v3731_v17  ;;  %v3733_v50 = vpop.eup %3732  ;;  %v3590_v2 = vld [vmem:[%s4741_s2 + $0x138] ss:$12 sps:$4 sm:$0xff]   ;;  %s3817_s2 = smov [#allocation2]  }
 0x85f   :  { %v3735_v47 = vpop.eup %3734  ;;  %s3013_s29 = sshll.u32 %s3817_s2, 4  ;;  %s3014_s29 = int_to_ptr.vmem [resolvable:$true] %s3013_s29 }
 0x860   :  { %v2474_v41 = vmul.f32 %v3733_v50, %v2473_v30  ;;  %v2653_v59 = vadd.f32 1.0, %v3735_v47  ;;  %s3790_s30 = scalar_lea.vmem %s3014_s29, 256  ;;  %p3795_p1 = scmp.lt.s32.totalorder %s3014_s29, %s3014_s29 }
 0x861   :  { %p3791_p0 = scmp.ne.s32.totalorder %s3014_s29, %s3790_s30  ;;  %p3796_p2 = scmp.lt.s32.totalorder %s3790_s30, %s3790_s30 }
 0x862   :  { %v3737_v14 = vpop.eup %3736  ;;  %v2475_v34 = vadd.f32 %v3731_v17, %v2474_v41 }
 0x863   :  { %v2657_v56 = vmul.f32 %v3737_v14, %v2656_v43  ;;  %p3797_p3 = por %p3796_p2, %p3795_p1 }
 0x864   :  { %v2663_v20 = vpack.c.bf16 %v2475_v34, %v2475_v34  ;;  %2854 = vst.msk [vmem:[#allocation2] sm:$0xff] %vm442_vm1, %v2475_v34 }
 0x865   :  { %v2658_v3 = vadd.f32 %v2657_v56, %v2552_v62  ;;  %p3798_p4 = pnand %p3797_p3, %p3791_p0 }
 0x866   :  { %3153 = vmatmul.mubr.msk.bf16.vlgmr.msra.gmra.mrb[68].mxu0 %vm442_vm1, %v2663_v20  ;;  %3457 = vmatmul.mubr.msk.bf16.vlgmr.msra.gmra.mrb[104].mxu1 %vm442_vm1, %v2663_v20 }
 0x867   :  { %3738 = vtanh.f32 %v2658_v3  ;;  %2753 = vmatpush1.bf16.msra.mxu0 %v4540_v39  ;;  %3461 = vmatpush3.bf16.msra.mxu1 %v4546_v8 }
 0x868   :  { %2754 = vmatprep.subr.bf16.mxu0 %v4552_v40  ;;  %3462 = vmatprep.subr.bf16.mxu1 %v4753_v22  ;;  %3740 = vrcp.f32 %v2653_v59 }
 0x869   :  { %2784 = vmatprep.mubr.bf16.mxu0 %v4754_v16  ;;  %3464 = vmatprep.mubr.msk.bf16.mxu1 %vm3816_vm2, %v4753_v22  ;;  %v2857_v16 = vpack.c.bf16 %v4305_v45, %v4234_v55  ;;  %v2858_v22 = vpack.c.bf16 %v4446_v48, %v4368_v4 }
 0x86b   :  { %2755 = vmatpush1.bf16.msra.mxu0 %v4563_v46  ;;  %3463 = vmatpush3.bf16.msra.mxu1 %v4569_v6  ;;  %v2859_v46 = vpack.c.bf16 %v4637_v57, %v4574_v15 }
 0x86c   :  { %3468 = vmatprep.subr.bf16.mxu0 %v3590_v2 }
 0x871   :  { %v3739_v39 = vpop.eup %3738 }
 0x872   :  { %v2660_v8 = vsub.f32 %v4637_v57, %v3739_v39  ;;  %v3741_v40 = vpop.eup %3740 }
 0x874   :  { %v2661_v12 = vmul.f32 %v3741_v40, %v2660_v8 }
 0x876   :  { %v2662_v36 = vadd.f32 %v3739_v39, %v2661_v12 }
 0x878   :  { %v2748_v37 = vpack.c.bf16 %v2662_v36, %v2662_v36 }
 0x87a   :  { %3155 = vmatmul.mubr.msk.bf16.vlgmr.msra.gmra.mrb[68].mxu0 %vm442_vm1, %v2748_v37  ;;  %3465 = vmatmul.mubr.msk.bf16.vlgmr.msra.gmra.mrb[108].mxu1 %vm442_vm1, %v2748_v37 }
 0x87b   :  { %3469 = vmatpush3.bf16.msra.mxu0 %v3590_v2  ;;  %3472 = vmatprep.mubr.msk.bf16.mxu0 %vm442_vm1, %v2857_v16 }
 0x87c   :  { %3470 = vmatprep.subr.bf16.mxu0 %v3591_v42 }
 0x87f   :  { %3471 = vmatpush3.bf16.msra.mxu0 %v3591_v42 }
 0x882   :  { %3473 = vmatmul.mubr.msk.bf16.vlgmr.msra.gmra.mrb[72].mxu0 %vm442_vm1, %v2858_v22 }
 0x883   :  { %3476 = vmatprep.mubr.msk.bf16.mxu0 %vm442_vm1, %v2859_v46 }
 0x939   :  { %v2742_v55 = vpop.f32.mrb[104].mxu1 }
 0x93a   :  { %v3458_v45 = vpop.f32.mrb[105].mxu1  ;;  %v2743_v28 = vadd.f32 %v2742_v55, %v4211_v60 }
 0x93b   :  { %v2745_v6 = vpop.f32.mrb[106].mxu1 }
 0x93c   :  { %v3459_v5 = vpop.f32.mrb[107].mxu1 }
 0x94d   :  { %v2786_v53 = vpop.f32.mrb[68].mxu0  ;;  %v2827_v29 = vpop.f32.mrb[108].mxu1 }
 0x94e   :  { %v3494_v13 = vadd.f32 %v2786_v53, %v4194_v19  ;;  %v2788_v24 = vpop.f32.mrb[69].mxu0  ;;  %v3466_v33 = vpop.f32.mrb[109].mxu1  ;;  %v2847_v31 = vadd.f32 %v4602_v49, %v2827_v29 }
 0x94f   :  { %v2790_v7 = vpop.f32.mrb[70].mxu0  ;;  %v2830_v1 = vpop.f32.mrb[110].mxu1  ;;  %v3495_v57 = vadd.f32 %v2788_v24, %v4199_v18 }
 0x950   :  { %v3157_v4 = vmul.f32 -1.442695, %v3494_v13  ;;  %v2791_v48 = vpop.f32.mrb[71].mxu0  ;;  %v3467_v58 = vpop.f32.mrb[111].mxu1 }
 0x951   :  { %v3158_v26 = vmul.f32 -1.442695, %v3495_v57 }
 0x952   :  { %3742 = vpow2.f32 %v3157_v4 }
 0x953   :  { %3744 = vpow2.f32 %v3158_v26 }
 0x955   :  { %v3474_v15 = vpop.f32.mrb[72].mxu0 }
 0x956   :  { %v2919_v9 = vpop.f32.mrb[73].mxu0 }
 0x957   :  { %v3475_v32 = vpop.f32.mrb[74].mxu0 }
 0x958   :  { %v2922_v10 = vpop.f32.mrb[75].mxu0 }
 0x95c   :  { %v3743_v63 = vpop.eup %3742 }
 0x95d   :  { %v2837_v11 = vadd.f32 1.0, %v3743_v63  ;;  %v3745_v19 = vpop.eup %3744 }
 0x95e   :  { %v2844_v54 = vadd.f32 1.0, %v3745_v19 }
 0x95f   :  { %3746 = vrcp.f32 %v2837_v11 }
 0x969   :  { %v3747_v25 = vpop.eup %3746 }
 0x96a   :  { %v2848_v21 = vmul.f32 %v3747_v25, %v2847_v31 }
 0x96c   :  { %v2849_v35 = vadd.f32 %v2848_v21, %v2743_v28 }
 0x96e   :  { %3748 = vtanh.f32 %v2849_v35 }
 0x96f   :  { %3750 = vrcp.f32 %v2844_v54 }
 0x978   :  { %v3749_v18 = vpop.eup %3748 }
 0x979   :  { %v2851_v61 = vsub.f32 %v2662_v36, %v3749_v18  ;;  %v3751_v52 = vpop.eup %3750 }
 0x97b   :  { %v2852_v0 = vmul.f32 %v3751_v52, %v2851_v61 }
 0x97d   :  { %v2853_v27 = vadd.f32 %v3749_v18, %v2852_v0 }
 0x97f   :  { %v2860_v51 = vpack.c.bf16 %v2853_v27, %v2662_v36  ;;  %2856 = vst.msk [vmem:[#allocation2 + $0x8] sm:$0xff] %vm442_vm1, %v2853_v27 }
 0x981   :  { %3477 = vmatmul.mubr.msk.bf16.gmra.mrb[76].mxu0 %vm442_vm1, %v2860_v51 }
 0x982   :  { %3801 = shalt.err (!%p3798_p4)
}
 0x983   :  { %s3802_s7 = scalar_lea.hbm %s4744_s5, 256 }
 0x984   :  { %p3803_p5 = scmp.ne.s32.totalorder %s4744_s5, %s3802_s7  ;;  %p3806_p6 = scmp.lt.u32.totalorder %s3802_s7, %s4744_s5 }
 0x986   :  { %p3808_p7 = pnand %p3806_p6, %p3803_p5 }
 0x988   :  { %3811 = shalt.err (!%p3808_p7)
}
 0x989   :  { %s3818_s12 = smov 128   ;;  %s3819_s13 = smov 8   ;;  %v98_v60 = vld [vmem:[%s4742_s3 + $0x4] ss:$0 sm:$0xff] }
 0x98a   :  { %3019 = dma.vmem_to_hbm [thread:$0]  %s3014_s29, 256, %s4744_s5, [#allocation3], %s3818_s12, %s3818_s12, %s3819_s13   ;;  %v2928_v38 = vadd.f32 %v3474_v15, %v98_v60  ;;  %v2920_v17 = vadd.f32 %v2919_v9, %v98_v60  ;;  %v2931_v41 = vadd.f32 %v3475_v32, %v98_v60  ;;  %v2923_v34 = vadd.f32 %v2922_v10, %v98_v60 }
 0xa54   :  { %v3478_v49 = vpop.f32.mrb[76].mxu0 }
 0xa55   :  { %v2944_v44 = vadd.f32 %v3478_v49, %v98_v60  ;;  %v2935_v23 = vpop.f32.mrb[77].mxu0 }
 0xa56   :  { %v2936_v30 = vadd.f32 %v2935_v23, %v98_v60  ;;  %v3479_v50 = vpop.f32.mrb[78].mxu0 }
 0xa57   :  { %v2952_v47 = vmax.f32 %v2928_v38, %v2944_v44  ;;  %v2947_v43 = vadd.f32 %v3479_v50, %v98_v60  ;;  %v2938_v14 = vpop.f32.mrb[79].mxu0 }
 0xa58   :  { %v2950_v62 = vmax.f32 %v2920_v17, %v2936_v30  ;;  %v2939_v56 = vadd.f32 %v2938_v14, %v98_v60 }
 0xa59   :  { %v2953_v20 = vmax.f32 %v2931_v41, %v2947_v43 }
 0xa5a   :  { %v2951_v3 = vmax.f32 %v2923_v34, %v2939_v56 }
 0xa5b   :  { %v2955_v59 = vmax.f32 %v2952_v47, %v2953_v20 }
 0xa5c   :  { %v2954_v2 = vmax.f32 %v2950_v62, %v2951_v3 }
 0xa5e   :  { %v2956_v39 = vmax.f32 %v2954_v2, %v2955_v59 }
 0xa60   :  { %v2957_v8 = vsub.f32 %v2920_v17, %v2956_v39  ;;  %v2958_v40 = vsub.f32 %v2923_v34, %v2956_v39  ;;  %v2959_v12 = vsub.f32 %v2928_v38, %v2956_v39  ;;  %v2960_v36 = vsub.f32 %v2931_v41, %v2956_v39 }
 0xa61   :  { %v2961_v37 = vsub.f32 %v2936_v30, %v2956_v39  ;;  %v2962_v42 = vsub.f32 %v2939_v56, %v2956_v39  ;;  %v2963_v16 = vsub.f32 %v2944_v44, %v2956_v39  ;;  %v2964_v22 = vsub.f32 %v2947_v43, %v2956_v39 }
 0xa62   :  { %v2965_v46 = vmul.f32 1.442695, %v2957_v8  ;;  %v2967_v55 = vmul.f32 1.442695, %v2958_v40  ;;  %v2969_v45 = vmul.f32 1.442695, %v2959_v12 }
 0xa63   :  { %v2971_v6 = vmul.f32 1.442695, %v2960_v36  ;;  %v2973_v5 = vmul.f32 1.442695, %v2961_v37  ;;  %v2975_v53 = vmul.f32 1.442695, %v2962_v42 }
 0xa64   :  { %3752 = vpow2.f32 %v2965_v46  ;;  %v2977_v29 = vmul.f32 1.442695, %v2963_v16  ;;  %v2979_v13 = vmul.f32 1.442695, %v2964_v22 }
 0xa65   :  { %3754 = vpow2.f32 %v2967_v55 }
 0xa66   :  { %3756 = vpow2.f32 %v2969_v45 }
 0xa67   :  { %3758 = vpow2.f32 %v2971_v6 }
 0xa68   :  { %3760 = vpow2.f32 %v2973_v5 }
 0xa69   :  { %3762 = vpow2.f32 %v2975_v53 }
 0xa6a   :  { %3764 = vpow2.f32 %v2977_v29 }
 0xa6b   :  { %3766 = vpow2.f32 %v2979_v13 }
 0xa6e   :  { %v3753_v24 = vpop.eup %3752 }
 0xa6f   :  { %v3755_v33 = vpop.eup %3754 }
 0xa70   :  { %v2981_v7 = vadd.f32 %v3755_v33, %v3753_v24  ;;  %v3757_v1 = vpop.eup %3756 }
 0xa71   :  { %v3759_v48 = vpop.eup %3758 }
 0xa72   :  { %v2982_v4 = vadd.f32 %v3757_v1, %v2981_v7  ;;  %v3761_v15 = vpop.eup %3760 }
 0xa73   :  { %v3763_v9 = vpop.eup %3762 }
 0xa74   :  { %v2983_v58 = vadd.f32 %v3759_v48, %v2982_v4  ;;  %v3765_v10 = vpop.eup %3764 }
 0xa75   :  { %v3767_v63 = vpop.eup %3766 }
 0xa76   :  { %v2984_v57 = vadd.f32 %v3761_v15, %v2983_v58 }
 0xa78   :  { %v2985_v32 = vadd.f32 %v3763_v9, %v2984_v57 }
 0xa7a   :  { %v2986_v26 = vadd.f32 %v3765_v10, %v2985_v32 }
 0xa7c   :  { %v2987_v11 = vadd.f32 %v3767_v63, %v2986_v26 }
 0xa7e   :  { %3768 = vlog2.f32 %v2987_v11 }
 0xa88   :  { %v3769_v19 = vpop.eup %3768 }
 0xa89   :  { %v2989_v31 = vmul.f32 0.6931472, %v3769_v19 }
 0xa8b   :  { %v2990_v25 = vsub.f32 %v2957_v8, %v2989_v31  ;;  %v2991_v28 = vsub.f32 %v2958_v40, %v2989_v31  ;;  %v2992_v21 = vsub.f32 %v2959_v12, %v2989_v31  ;;  %v2993_v35 = vsub.f32 %v2960_v36, %v2989_v31 }
 0xa8c   :  { %v2994_v54 = vsub.f32 %v2961_v37, %v2989_v31  ;;  %v2995_v18 = vsub.f32 %v2962_v42, %v2989_v31  ;;  %v2996_v61 = vsub.f32 %v2963_v16, %v2989_v31  ;;  %v2997_v52 = vsub.f32 %v2964_v22, %v2989_v31 }
 0xa8d   :  { %2998 = vst [vmem:[%s4743_s4] sm:$0xff] %v2990_v25  ;;  %2999 = vst [vmem:[%s4743_s4 + $0x8] sm:$0xff] %v2991_v28 }
 0xa8e   :  { %3000 = vst [vmem:[%s4743_s4 + $0x10] sm:$0xff] %v2992_v21  ;;  %3001 = vst [vmem:[%s4743_s4 + $0x18] sm:$0xff] %v2993_v35 }
 0xa8f   :  { %3002 = vst [vmem:[%s4743_s4 + $0x20] sm:$0xff] %v2994_v54  ;;  %3003 = vst [vmem:[%s4743_s4 + $0x28] sm:$0xff] %v2995_v18 }
 0xa90   :  { %3004 = vst [vmem:[%s4743_s4 + $0x30] sm:$0xff] %v2996_v61  ;;  %3005 = vst [vmem:[%s4743_s4 + $0x38] sm:$0xff] %v2997_v52 }
 0xa91   :  { %3812 = dma.done.wait [#allocation3], 256  }
 0xa92   :  { %3813 = vsyncadd [#allocation3], 4294967040 }
 0xa93   :  { %3025 = vsyncpa [#allocation3], 1 }

</bundles_post_ra>
